<compile_context>
chip_gen: v7x
topology: tpu7x:2x2x1
jax: 0.10.0
libtpu: 0.0.40
codegen_flags: <defaults>
</compile_context>

<pallas_src>
import jax
import jax.numpy as jnp
from jax.experimental import pallas as pl
from jax.experimental.pallas import tpu as pltpu

LANE = 128   # lane-axis padding (features / hidden / src-node dims)
SUB = 16     # sublane-axis padding for the edge-label dim (bf16 sublane pack)


def round_up(x, m):
    return ((x + m - 1) // m) * m


# ---------------------------------------------------------------------------
# Fused Pallas kernel: 3 hetero SAGE layers + edge decoder in a single launch.
# ---------------------------------------------------------------------------
def _fused_gae_kernel(adj_cp_ref, adj_pc_ref, xc_ref, xp_ref,
                      wl_cp_ref, wr_cp_ref, b_cp_ref,
                      wl_pc_ref, wr_pc_ref, b_pc_ref,
                      gc_ref, gp_ref, wdc_ref, wdp_ref, bd_ref,
                      z_ref, x_ref):
    f32 = jnp.float32
    bf16 = jnp.bfloat16

    adj_cp = adj_cp_ref[...]          # [P_p, C_p]  row-normalized mean adjacency
    adj_pc = adj_pc_ref[...]          # [C_p, P_p]
    zc = xc_ref[...]                  # [C_p, F_p]  bf16
    zp = xp_ref[...]                  # [P_p, F_p]  bf16

    def sage(adj, x_src, x_dst, wl, wr, b):
        # Reassociated aggregation: adj @ (x_src @ wl); bias + self term + relu.
        h_src = jnp.dot(x_src, wl, preferred_element_type=f32).astype(bf16)
        out = (jnp.dot(adj, h_src, preferred_element_type=f32)
               + jnp.dot(x_dst, wr, preferred_element_type=f32)
               + b)
        return jnp.maximum(out, 0.0).astype(bf16)   # relu after every layer

    for l in range(3):                # unrolled; chem/protein ping-pong
        new_zp = sage(adj_cp, zc, zp, wl_cp_ref[l], wr_cp_ref[l], b_cp_ref[l])
        new_zc = sage(adj_pc, zp, zc, wl_pc_ref[l], wr_pc_ref[l], b_pc_ref[l])
        zc, zp = new_zc, new_zp

    # --- edge decoder --------------------------------------------------------
    # Gather z_chem[row] / z_prot[col] via one-hot matmuls (MXU) so the final
    # embeddings never leave VMEM.
    zc_g = jnp.dot(gc_ref[...], zc, preferred_element_type=f32)   # [E_p, F_p]
    zp_g = jnp.dot(gp_ref[...], zp, preferred_element_type=f32)   # [E_p, F_p]

    h = zc_g.shape[1]
    # x = cat([zc_g, zp_g], -1): two lane-aligned slice stores, no in-kernel concat.
    x_ref[:, 0:h] = zc_g
    x_ref[:, h:2 * h] = zp_g

    # lin1 split into chem / protein halves; lane-dense [E_p, 128] logit block
    # (real logit lives in lane 0, padded lanes are exactly zero weights).
    z_ref[...] = (jnp.dot(zc_g, wdc_ref[...], preferred_element_type=f32)
                  + jnp.dot(zp_g, wdp_ref[...], preferred_element_type=f32)
                  + bd_ref[...])


# ---------------------------------------------------------------------------
# Plain-JAX glue: padding, dense mean adjacency, one-hot gathers, param packing
# ---------------------------------------------------------------------------
def _pad2(a, rows, cols, dtype):
    out = jnp.zeros((rows, cols), jnp.float32)
    out = out.at[:a.shape[0], :a.shape[1]].set(a)
    return out.astype(dtype)


def build_mean_adj(edge_index, n_src_p, n_dst_p):
    """Dense row-normalized A[d, s] so that A @ x_src == scatter-mean (padded, bf16)."""
    src, dst = edge_index[0], edge_index[1]
    a = jnp.zeros((n_dst_p, n_src_p), jnp.float32).at[dst, src].add(1.0)
    deg = a.sum(axis=1, keepdims=True)
    return (a / jnp.maximum(deg, 1.0)).astype(jnp.bfloat16)


def build_onehot(idx, rows_p, cols_p):
    e = idx.shape[0]
    g = jnp.zeros((rows_p, cols_p), jnp.float32)
    g = g.at[jnp.arange(e), idx].set(1.0)
    return g.astype(jnp.bfloat16)


def init_linear(key, f_in, f_out, with_bias=True):
    kw, kb = jax.random.split(key)
    scale = 1.0 / jnp.sqrt(jnp.float32(f_in))
    w = jax.random.uniform(kw, (f_in, f_out), jnp.float32, -scale, scale)
    b = (jax.random.uniform(kb, (1, f_out), jnp.float32, -scale, scale)
         if with_bias else None)
    return w, b


def init_params(key, f_chem, f_prot, hidden):
    params = {"convs": []}
    dims = [(f_chem, f_prot), (hidden, hidden), (hidden, hidden)]  # lazy (-1,-1)
    for layer in range(3):
        fc, fp = dims[layer]
        key, k1, k2, k3, k4 = jax.random.split(key, 5)
        wl_cp, b_cp = init_linear(k1, fc, hidden, True)    # chem -> protein
        wr_cp, _ = init_linear(k2, fp, hidden, False)
        wl_pc, b_pc = init_linear(k3, fp, hidden, True)    # protein -> chem
        wr_pc, _ = init_linear(k4, fc, hidden, False)
        params["convs"].append({
            "cp": {"wl": wl_cp, "wr": wr_cp, "b": b_cp},
            "pc": {"wl": wl_pc, "wr": wr_pc, "b": b_pc},
        })
    key, kd = jax.random.split(key)
    w1, b1 = init_linear(kd, 2 * hidden, 1, True)
    params["decoder"] = {"w1": w1, "b1": b1}
    return params


def pack_params(params, feat_p):
    bf16, f32 = jnp.bfloat16, jnp.float32

    def stack_w(which, name):
        return jnp.stack([_pad2(params["convs"][l][which][name],
                                feat_p, feat_p, bf16) for l in range(3)])

    def stack_b(which):
        return jnp.stack([_pad2(params["convs"][l][which]["b"],
                                1, feat_p, f32) for l in range(3)])

    w1 = params["decoder"]["w1"]        # [2*hidden, 1]
    b1 = params["decoder"]["b1"]        # [1, 1]
    hidden = w1.shape[0] // 2
    return {
        "wl_cp": stack_w("cp", "wl"), "wr_cp": stack_w("cp", "wr"),
        "b_cp": stack_b("cp"),
        "wl_pc": stack_w("pc", "wl"), "wr_pc": stack_w("pc", "wr"),
        "b_pc": stack_b("pc"),
        "wdc": _pad2(w1[:hidden], feat_p, LANE, f32),
        "wdp": _pad2(w1[hidden:], feat_p, LANE, f32),
        "bd": _pad2(b1, 1, LANE, f32),
    }


def model_forward(params, x_dict, edge_index_dict, edge_label_index):
    x_chem = x_dict["chem"]
    x_prot = x_dict["protein"]
    n_chem, f_chem = x_chem.shape
    n_prot, f_prot = x_prot.shape
    hidden = params["decoder"]["w1"].shape[0] // 2
    e_lab = edge_label_index.shape[1]

    n_chem_p = round_up(n_chem, LANE)
    n_prot_p = round_up(n_prot, LANE)
    e_p = round_up(e_lab, SUB)
    feat_p = round_up(max(f_chem, f_prot, hidden), LANE)

    adj_cp = build_mean_adj(edge_index_dict[("chem", "to", "protein")],
                            n_chem_p, n_prot_p)     # [P_p, C_p]
    adj_pc = build_mean_adj(edge_index_dict[("protein", "rev_to", "chem")],
                            n_prot_p, n_chem_p)     # [C_p, P_p]

    xc = _pad2(x_chem, n_chem_p, feat_p, jnp.bfloat16)
    xp = _pad2(x_prot, n_prot_p, feat_p, jnp.bfloat16)

    row, col = edge_label_index[0], edge_label_index[1]
    gc = build_onehot(row, e_p, n_chem_p)
    gp = build_onehot(col, e_p, n_prot_p)

    packed = pack_params(params, feat_p)

    vmem = pl.BlockSpec(memory_space=pltpu.MemorySpace.VMEM)
    inputs = (adj_cp, adj_pc, xc, xp,
              packed["wl_cp"], packed["wr_cp"], packed["b_cp"],
              packed["wl_pc"], packed["wr_pc"], packed["b_pc"],
              gc, gp, packed["wdc"], packed["wdp"], packed["bd"])

    z_block, x_block = pl.pallas_call(
        _fused_gae_kernel,
        out_shape=(jax.ShapeDtypeStruct((e_p, LANE), jnp.float32),
                   jax.ShapeDtypeStruct((e_p, 2 * feat_p), jnp.float32)),
        in_specs=[vmem] * len(inputs),
        out_specs=(vmem, vmem),
        compiler_params=pltpu.CompilerParams(vmem_limit_bytes=32 * 1024 * 1024),
    )(*inputs)

    # Strip padding back to the reference shapes.
    z2 = z_block[:e_lab, 0]
    x_cat = jnp.concatenate([x_block[:e_lab, :hidden],
                             x_block[:e_lab, feat_p:feat_p + hidden]], axis=-1)
    return z2, x_cat, edge_label_index


# ---------------------------------------------------------------------------
# Main
# ---------------------------------------------------------------------------
if __name__ == "__main__":
    key = jax.random.PRNGKey(0)

    n_chem, n_prot = 16, 24
    f_chem, f_prot = 16, 24
    hidden = 32
    e_cp, e_pc, e_lab = 40, 40, 8

    key, k1, k2, k3, k4, k5, k6, k7, kp = jax.random.split(key, 9)
    x_dict = {
        "chem": jax.random.normal(k1, (n_chem, f_chem), jnp.float32),
        "protein": jax.random.normal(k2, (n_prot, f_prot), jnp.float32),
    }
    edge_index_dict = {
        ("chem", "to", "protein"): jnp.stack([
            jax.random.randint(k3, (e_cp,), 0, n_chem),
            jax.random.randint(k4, (e_cp,), 0, n_prot)]),
        ("protein", "rev_to", "chem"): jnp.stack([
            jax.random.randint(k5, (e_pc,), 0, n_prot),
            jax.random.randint(k6, (e_pc,), 0, n_chem)]),
    }
    edge_label_index = jnp.stack([
        jax.random.randint(k7, (e_lab,), 0, n_chem),
        jax.random.randint(key, (e_lab,), 0, n_prot)])

    params = init_params(kp, f_chem, f_prot, hidden)

    z2, x_cat, eli = model_forward(params, x_dict, edge_index_dict,
                                   edge_label_index)
    jax.block_until_ready((z2, x_cat, eli))

    assert z2.shape == (e_lab,)
    assert x_cat.shape == (e_lab, 2 * hidden)
    assert eli.shape == (2, e_lab)
    print("KERNEL_OK")
</pallas_src>

<mosaic_0001>
module attributes {stable_mosaic.version = 11 : i64} {
  func.func @_fused_gae_kernel(%arg0: memref<128x128xbf16, #tpu.memory_space<vmem>>, %arg1: memref<128x128xbf16, #tpu.memory_space<vmem>>, %arg2: memref<128x128xbf16, #tpu.memory_space<vmem>>, %arg3: memref<128x128xbf16, #tpu.memory_space<vmem>>, %arg4: memref<3x128x128xbf16, #tpu.memory_space<vmem>>, %arg5: memref<3x128x128xbf16, #tpu.memory_space<vmem>>, %arg6: memref<3x1x128xf32, #tpu.memory_space<vmem>>, %arg7: memref<3x128x128xbf16, #tpu.memory_space<vmem>>, %arg8: memref<3x128x128xbf16, #tpu.memory_space<vmem>>, %arg9: memref<3x1x128xf32, #tpu.memory_space<vmem>>, %arg10: memref<16x128xbf16, #tpu.memory_space<vmem>>, %arg11: memref<16x128xbf16, #tpu.memory_space<vmem>>, %arg12: memref<128x128xf32, #tpu.memory_space<vmem>>, %arg13: memref<128x128xf32, #tpu.memory_space<vmem>>, %arg14: memref<1x128xf32, #tpu.memory_space<vmem>>, %arg15: memref<16x128xf32, #tpu.memory_space<vmem>>, %arg16: memref<16x256xf32, #tpu.memory_space<vmem>>) attributes {dimension_semantics = [], scalar_prefetch = 0 : i64, scratch_operands = 0 : i64, tpu.core_type = #tpu.core_type<tc>} {
    %c0 = arith.constant 0 : index
    %c0_0 = arith.constant 0 : index
    %0 = vector.load %arg0[%c0, %c0_0] : memref<128x128xbf16, #tpu.memory_space<vmem>>, vector<128x128xbf16>
    %c0_1 = arith.constant 0 : index
    %c0_2 = arith.constant 0 : index
    %1 = vector.load %arg1[%c0_1, %c0_2] : memref<128x128xbf16, #tpu.memory_space<vmem>>, vector<128x128xbf16>
    %c0_3 = arith.constant 0 : index
    %c0_4 = arith.constant 0 : index
    %2 = vector.load %arg2[%c0_3, %c0_4] : memref<128x128xbf16, #tpu.memory_space<vmem>>, vector<128x128xbf16>
    %c0_5 = arith.constant 0 : index
    %c0_6 = arith.constant 0 : index
    %3 = vector.load %arg3[%c0_5, %c0_6] : memref<128x128xbf16, #tpu.memory_space<vmem>>, vector<128x128xbf16>
    %c0_7 = arith.constant 0 : index
    %c0_8 = arith.constant 0 : index
    %c0_9 = arith.constant 0 : index
    %4 = vector.load %arg4[%c0_7, %c0_8, %c0_9] : memref<3x128x128xbf16, #tpu.memory_space<vmem>>, vector<1x128x128xbf16>
    %5 = vector.shape_cast %4 : vector<1x128x128xbf16> to vector<128x128xbf16>
    %c0_10 = arith.constant 0 : index
    %c0_11 = arith.constant 0 : index
    %c0_12 = arith.constant 0 : index
    %6 = vector.load %arg5[%c0_10, %c0_11, %c0_12] : memref<3x128x128xbf16, #tpu.memory_space<vmem>>, vector<1x128x128xbf16>
    %7 = vector.shape_cast %6 : vector<1x128x128xbf16> to vector<128x128xbf16>
    %c0_13 = arith.constant 0 : index
    %c0_14 = arith.constant 0 : index
    %c0_15 = arith.constant 0 : index
    %8 = vector.load %arg6[%c0_13, %c0_14, %c0_15] : memref<3x1x128xf32, #tpu.memory_space<vmem>>, vector<1x1x128xf32>
    %9 = vector.shape_cast %8 : vector<1x1x128xf32> to vector<1x128xf32>
    %cst = arith.constant dense<0.000000e+00> : vector<128x128xf32>
    %10 = tpu.matmul %2, %5, %cst {dimension_numbers = #tpu.dot_dimension_numbers<[1], [0], [0], [1], [0, 0, 1, 1], [], []>} : vector<128x128xbf16>, vector<128x128xbf16>, vector<128x128xf32> -> vector<128x128xf32>
    %11 = arith.truncf %10 : vector<128x128xf32> to vector<128x128xbf16>
    %cst_16 = arith.constant dense<0.000000e+00> : vector<128x128xf32>
    %12 = tpu.matmul %0, %11, %cst_16 {dimension_numbers = #tpu.dot_dimension_numbers<[1], [0], [0], [1], [0, 0, 1, 1], [], []>} : vector<128x128xbf16>, vector<128x128xbf16>, vector<128x128xf32> -> vector<128x128xf32>
    %cst_17 = arith.constant dense<0.000000e+00> : vector<128x128xf32>
    %13 = tpu.matmul %3, %7, %cst_17 {dimension_numbers = #tpu.dot_dimension_numbers<[1], [0], [0], [1], [0, 0, 1, 1], [], []>} : vector<128x128xbf16>, vector<128x128xbf16>, vector<128x128xf32> -> vector<128x128xf32>
    %14 = arith.addf %12, %13 : vector<128x128xf32>
    %15 = vector.broadcast %9 : vector<1x128xf32> to vector<128x128xf32>
    %16 = arith.addf %14, %15 : vector<128x128xf32>
    %cst_18 = arith.constant 0.000000e+00 : f32
    %17 = vector.broadcast %cst_18 : f32 to vector<128x128xf32>
    %18 = arith.maximumf %16, %17 : vector<128x128xf32>
    %19 = arith.truncf %18 : vector<128x128xf32> to vector<128x128xbf16>
    %c0_19 = arith.constant 0 : index
    %c0_20 = arith.constant 0 : index
    %c0_21 = arith.constant 0 : index
    %20 = vector.load %arg7[%c0_19, %c0_20, %c0_21] : memref<3x128x128xbf16, #tpu.memory_space<vmem>>, vector<1x128x128xbf16>
    %21 = vector.shape_cast %20 : vector<1x128x128xbf16> to vector<128x128xbf16>
    %c0_22 = arith.constant 0 : index
    %c0_23 = arith.constant 0 : index
    %c0_24 = arith.constant 0 : index
    %22 = vector.load %arg8[%c0_22, %c0_23, %c0_24] : memref<3x128x128xbf16, #tpu.memory_space<vmem>>, vector<1x128x128xbf16>
    %23 = vector.shape_cast %22 : vector<1x128x128xbf16> to vector<128x128xbf16>
    %c0_25 = arith.constant 0 : index
    %c0_26 = arith.constant 0 : index
    %c0_27 = arith.constant 0 : index
    %24 = vector.load %arg9[%c0_25, %c0_26, %c0_27] : memref<3x1x128xf32, #tpu.memory_space<vmem>>, vector<1x1x128xf32>
    %25 = vector.shape_cast %24 : vector<1x1x128xf32> to vector<1x128xf32>
    %cst_28 = arith.constant dense<0.000000e+00> : vector<128x128xf32>
    %26 = tpu.matmul %3, %21, %cst_28 {dimension_numbers = #tpu.dot_dimension_numbers<[1], [0], [0], [1], [0, 0, 1, 1], [], []>} : vector<128x128xbf16>, vector<128x128xbf16>, vector<128x128xf32> -> vector<128x128xf32>
    %27 = arith.truncf %26 : vector<128x128xf32> to vector<128x128xbf16>
    %cst_29 = arith.constant dense<0.000000e+00> : vector<128x128xf32>
    %28 = tpu.matmul %1, %27, %cst_29 {dimension_numbers = #tpu.dot_dimension_numbers<[1], [0], [0], [1], [0, 0, 1, 1], [], []>} : vector<128x128xbf16>, vector<128x128xbf16>, vector<128x128xf32> -> vector<128x128xf32>
    %cst_30 = arith.constant dense<0.000000e+00> : vector<128x128xf32>
    %29 = tpu.matmul %2, %23, %cst_30 {dimension_numbers = #tpu.dot_dimension_numbers<[1], [0], [0], [1], [0, 0, 1, 1], [], []>} : vector<128x128xbf16>, vector<128x128xbf16>, vector<128x128xf32> -> vector<128x128xf32>
    %30 = arith.addf %28, %29 : vector<128x128xf32>
    %31 = vector.broadcast %25 : vector<1x128xf32> to vector<128x128xf32>
    %32 = arith.addf %30, %31 : vector<128x128xf32>
    %cst_31 = arith.constant 0.000000e+00 : f32
    %33 = vector.broadcast %cst_31 : f32 to vector<128x128xf32>
    %34 = arith.maximumf %32, %33 : vector<128x128xf32>
    %35 = arith.truncf %34 : vector<128x128xf32> to vector<128x128xbf16>
    %c1 = arith.constant 1 : index
    %c0_32 = arith.constant 0 : index
    %c0_33 = arith.constant 0 : index
    %36 = vector.load %arg4[%c1, %c0_32, %c0_33] : memref<3x128x128xbf16, #tpu.memory_space<vmem>>, vector<1x128x128xbf16>
    %37 = vector.shape_cast %36 : vector<1x128x128xbf16> to vector<128x128xbf16>
    %c1_34 = arith.constant 1 : index
    %c0_35 = arith.constant 0 : index
    %c0_36 = arith.constant 0 : index
    %38 = vector.load %arg5[%c1_34, %c0_35, %c0_36] : memref<3x128x128xbf16, #tpu.memory_space<vmem>>, vector<1x128x128xbf16>
    %39 = vector.shape_cast %38 : vector<1x128x128xbf16> to vector<128x128xbf16>
    %c1_37 = arith.constant 1 : index
    %c0_38 = arith.constant 0 : index
    %c0_39 = arith.constant 0 : index
    %40 = vector.load %arg6[%c1_37, %c0_38, %c0_39] : memref<3x1x128xf32, #tpu.memory_space<vmem>>, vector<1x1x128xf32>
    %41 = vector.shape_cast %40 : vector<1x1x128xf32> to vector<1x128xf32>
    %cst_40 = arith.constant dense<0.000000e+00> : vector<128x128xf32>
    %42 = tpu.matmul %35, %37, %cst_40 {dimension_numbers = #tpu.dot_dimension_numbers<[1], [0], [0], [1], [0, 0, 1, 1], [], []>} : vector<128x128xbf16>, vector<128x128xbf16>, vector<128x128xf32> -> vector<128x128xf32>
    %43 = arith.truncf %42 : vector<128x128xf32> to vector<128x128xbf16>
    %cst_41 = arith.constant dense<0.000000e+00> : vector<128x128xf32>
    %44 = tpu.matmul %0, %43, %cst_41 {dimension_numbers = #tpu.dot_dimension_numbers<[1], [0], [0], [1], [0, 0, 1, 1], [], []>} : vector<128x128xbf16>, vector<128x128xbf16>, vector<128x128xf32> -> vector<128x128xf32>
    %cst_42 = arith.constant dense<0.000000e+00> : vector<128x128xf32>
    %45 = tpu.matmul %19, %39, %cst_42 {dimension_numbers = #tpu.dot_dimension_numbers<[1], [0], [0], [1], [0, 0, 1, 1], [], []>} : vector<128x128xbf16>, vector<128x128xbf16>, vector<128x128xf32> -> vector<128x128xf32>
    %46 = arith.addf %44, %45 : vector<128x128xf32>
    %47 = vector.broadcast %41 : vector<1x128xf32> to vector<128x128xf32>
    %48 = arith.addf %46, %47 : vector<128x128xf32>
    %cst_43 = arith.constant 0.000000e+00 : f32
    %49 = vector.broadcast %cst_43 : f32 to vector<128x128xf32>
    %50 = arith.maximumf %48, %49 : vector<128x128xf32>
    %51 = arith.truncf %50 : vector<128x128xf32> to vector<128x128xbf16>
    %c1_44 = arith.constant 1 : index
    %c0_45 = arith.constant 0 : index
    %c0_46 = arith.constant 0 : index
    %52 = vector.load %arg7[%c1_44, %c0_45, %c0_46] : memref<3x128x128xbf16, #tpu.memory_space<vmem>>, vector<1x128x128xbf16>
    %53 = vector.shape_cast %52 : vector<1x128x128xbf16> to vector<128x128xbf16>
    %c1_47 = arith.constant 1 : index
    %c0_48 = arith.constant 0 : index
    %c0_49 = arith.constant 0 : index
    %54 = vector.load %arg8[%c1_47, %c0_48, %c0_49] : memref<3x128x128xbf16, #tpu.memory_space<vmem>>, vector<1x128x128xbf16>
    %55 = vector.shape_cast %54 : vector<1x128x128xbf16> to vector<128x128xbf16>
    %c1_50 = arith.constant 1 : index
    %c0_51 = arith.constant 0 : index
    %c0_52 = arith.constant 0 : index
    %56 = vector.load %arg9[%c1_50, %c0_51, %c0_52] : memref<3x1x128xf32, #tpu.memory_space<vmem>>, vector<1x1x128xf32>
    %57 = vector.shape_cast %56 : vector<1x1x128xf32> to vector<1x128xf32>
    %cst_53 = arith.constant dense<0.000000e+00> : vector<128x128xf32>
    %58 = tpu.matmul %19, %53, %cst_53 {dimension_numbers = #tpu.dot_dimension_numbers<[1], [0], [0], [1], [0, 0, 1, 1], [], []>} : vector<128x128xbf16>, vector<128x128xbf16>, vector<128x128xf32> -> vector<128x128xf32>
    %59 = arith.truncf %58 : vector<128x128xf32> to vector<128x128xbf16>
    %cst_54 = arith.constant dense<0.000000e+00> : vector<128x128xf32>
    %60 = tpu.matmul %1, %59, %cst_54 {dimension_numbers = #tpu.dot_dimension_numbers<[1], [0], [0], [1], [0, 0, 1, 1], [], []>} : vector<128x128xbf16>, vector<128x128xbf16>, vector<128x128xf32> -> vector<128x128xf32>
    %cst_55 = arith.constant dense<0.000000e+00> : vector<128x128xf32>
    %61 = tpu.matmul %35, %55, %cst_55 {dimension_numbers = #tpu.dot_dimension_numbers<[1], [0], [0], [1], [0, 0, 1, 1], [], []>} : vector<128x128xbf16>, vector<128x128xbf16>, vector<128x128xf32> -> vector<128x128xf32>
    %62 = arith.addf %60, %61 : vector<128x128xf32>
    %63 = vector.broadcast %57 : vector<1x128xf32> to vector<128x128xf32>
    %64 = arith.addf %62, %63 : vector<128x128xf32>
    %cst_56 = arith.constant 0.000000e+00 : f32
    %65 = vector.broadcast %cst_56 : f32 to vector<128x128xf32>
    %66 = arith.maximumf %64, %65 : vector<128x128xf32>
    %67 = arith.truncf %66 : vector<128x128xf32> to vector<128x128xbf16>
    %c2 = arith.constant 2 : index
    %c0_57 = arith.constant 0 : index
    %c0_58 = arith.constant 0 : index
    %68 = vector.load %arg4[%c2, %c0_57, %c0_58] : memref<3x128x128xbf16, #tpu.memory_space<vmem>>, vector<1x128x128xbf16>
    %69 = vector.shape_cast %68 : vector<1x128x128xbf16> to vector<128x128xbf16>
    %c2_59 = arith.constant 2 : index
    %c0_60 = arith.constant 0 : index
    %c0_61 = arith.constant 0 : index
    %70 = vector.load %arg5[%c2_59, %c0_60, %c0_61] : memref<3x128x128xbf16, #tpu.memory_space<vmem>>, vector<1x128x128xbf16>
    %71 = vector.shape_cast %70 : vector<1x128x128xbf16> to vector<128x128xbf16>
    %c2_62 = arith.constant 2 : index
    %c0_63 = arith.constant 0 : index
    %c0_64 = arith.constant 0 : index
    %72 = vector.load %arg6[%c2_62, %c0_63, %c0_64] : memref<3x1x128xf32, #tpu.memory_space<vmem>>, vector<1x1x128xf32>
    %73 = vector.shape_cast %72 : vector<1x1x128xf32> to vector<1x128xf32>
    %cst_65 = arith.constant dense<0.000000e+00> : vector<128x128xf32>
    %74 = tpu.matmul %67, %69, %cst_65 {dimension_numbers = #tpu.dot_dimension_numbers<[1], [0], [0], [1], [0, 0, 1, 1], [], []>} : vector<128x128xbf16>, vector<128x128xbf16>, vector<128x128xf32> -> vector<128x128xf32>
    %75 = arith.truncf %74 : vector<128x128xf32> to vector<128x128xbf16>
    %cst_66 = arith.constant dense<0.000000e+00> : vector<128x128xf32>
    %76 = tpu.matmul %0, %75, %cst_66 {dimension_numbers = #tpu.dot_dimension_numbers<[1], [0], [0], [1], [0, 0, 1, 1], [], []>} : vector<128x128xbf16>, vector<128x128xbf16>, vector<128x128xf32> -> vector<128x128xf32>
    %cst_67 = arith.constant dense<0.000000e+00> : vector<128x128xf32>
    %77 = tpu.matmul %51, %71, %cst_67 {dimension_numbers = #tpu.dot_dimension_numbers<[1], [0], [0], [1], [0, 0, 1, 1], [], []>} : vector<128x128xbf16>, vector<128x128xbf16>, vector<128x128xf32> -> vector<128x128xf32>
    %78 = arith.addf %76, %77 : vector<128x128xf32>
    %79 = vector.broadcast %73 : vector<1x128xf32> to vector<128x128xf32>
    %80 = arith.addf %78, %79 : vector<128x128xf32>
    %cst_68 = arith.constant 0.000000e+00 : f32
    %81 = vector.broadcast %cst_68 : f32 to vector<128x128xf32>
    %82 = arith.maximumf %80, %81 : vector<128x128xf32>
    %83 = arith.truncf %82 : vector<128x128xf32> to vector<128x128xbf16>
    %c2_69 = arith.constant 2 : index
    %c0_70 = arith.constant 0 : index
    %c0_71 = arith.constant 0 : index
    %84 = vector.load %arg7[%c2_69, %c0_70, %c0_71] : memref<3x128x128xbf16, #tpu.memory_space<vmem>>, vector<1x128x128xbf16>
    %85 = vector.shape_cast %84 : vector<1x128x128xbf16> to vector<128x128xbf16>
    %c2_72 = arith.constant 2 : index
    %c0_73 = arith.constant 0 : index
    %c0_74 = arith.constant 0 : index
    %86 = vector.load %arg8[%c2_72, %c0_73, %c0_74] : memref<3x128x128xbf16, #tpu.memory_space<vmem>>, vector<1x128x128xbf16>
    %87 = vector.shape_cast %86 : vector<1x128x128xbf16> to vector<128x128xbf16>
    %c2_75 = arith.constant 2 : index
    %c0_76 = arith.constant 0 : index
    %c0_77 = arith.constant 0 : index
    %88 = vector.load %arg9[%c2_75, %c0_76, %c0_77] : memref<3x1x128xf32, #tpu.memory_space<vmem>>, vector<1x1x128xf32>
    %89 = vector.shape_cast %88 : vector<1x1x128xf32> to vector<1x128xf32>
    %cst_78 = arith.constant dense<0.000000e+00> : vector<128x128xf32>
    %90 = tpu.matmul %51, %85, %cst_78 {dimension_numbers = #tpu.dot_dimension_numbers<[1], [0], [0], [1], [0, 0, 1, 1], [], []>} : vector<128x128xbf16>, vector<128x128xbf16>, vector<128x128xf32> -> vector<128x128xf32>
    %91 = arith.truncf %90 : vector<128x128xf32> to vector<128x128xbf16>
    %cst_79 = arith.constant dense<0.000000e+00> : vector<128x128xf32>
    %92 = tpu.matmul %1, %91, %cst_79 {dimension_numbers = #tpu.dot_dimension_numbers<[1], [0], [0], [1], [0, 0, 1, 1], [], []>} : vector<128x128xbf16>, vector<128x128xbf16>, vector<128x128xf32> -> vector<128x128xf32>
    %cst_80 = arith.constant dense<0.000000e+00> : vector<128x128xf32>
    %93 = tpu.matmul %67, %87, %cst_80 {dimension_numbers = #tpu.dot_dimension_numbers<[1], [0], [0], [1], [0, 0, 1, 1], [], []>} : vector<128x128xbf16>, vector<128x128xbf16>, vector<128x128xf32> -> vector<128x128xf32>
    %94 = arith.addf %92, %93 : vector<128x128xf32>
    %95 = vector.broadcast %89 : vector<1x128xf32> to vector<128x128xf32>
    %96 = arith.addf %94, %95 : vector<128x128xf32>
    %cst_81 = arith.constant 0.000000e+00 : f32
    %97 = vector.broadcast %cst_81 : f32 to vector<128x128xf32>
    %98 = arith.maximumf %96, %97 : vector<128x128xf32>
    %99 = arith.truncf %98 : vector<128x128xf32> to vector<128x128xbf16>
    %c0_82 = arith.constant 0 : index
    %c0_83 = arith.constant 0 : index
    %100 = vector.load %arg10[%c0_82, %c0_83] : memref<16x128xbf16, #tpu.memory_space<vmem>>, vector<16x128xbf16>
    %cst_84 = arith.constant dense<0.000000e+00> : vector<16x128xf32>
    %101 = tpu.matmul %100, %99, %cst_84 {dimension_numbers = #tpu.dot_dimension_numbers<[1], [0], [0], [1], [0, 0, 1, 1], [], []>} : vector<16x128xbf16>, vector<128x128xbf16>, vector<16x128xf32> -> vector<16x128xf32>
    %c0_85 = arith.constant 0 : index
    %c0_86 = arith.constant 0 : index
    %102 = vector.load %arg11[%c0_85, %c0_86] : memref<16x128xbf16, #tpu.memory_space<vmem>>, vector<16x128xbf16>
    %cst_87 = arith.constant dense<0.000000e+00> : vector<16x128xf32>
    %103 = tpu.matmul %102, %83, %cst_87 {dimension_numbers = #tpu.dot_dimension_numbers<[1], [0], [0], [1], [0, 0, 1, 1], [], []>} : vector<16x128xbf16>, vector<128x128xbf16>, vector<16x128xf32> -> vector<16x128xf32>
    %c0_88 = arith.constant 0 : index
    %c0_89 = arith.constant 0 : index
    %104 = vector.load %arg16[%c0_88, %c0_89] : memref<16x256xf32, #tpu.memory_space<vmem>>, vector<16x128xf32>
    tpu.vector_store %arg16[%c0_88, %c0_89], %101 {strides = array<i32>} : memref<16x256xf32, #tpu.memory_space<vmem>>, vector<16x128xf32>,
    %c0_90 = arith.constant 0 : index
    %c128 = arith.constant 128 : index
    %105 = vector.load %arg16[%c0_90, %c128] : memref<16x256xf32, #tpu.memory_space<vmem>>, vector<16x128xf32>
    tpu.vector_store %arg16[%c0_90, %c128], %103 {strides = array<i32>} : memref<16x256xf32, #tpu.memory_space<vmem>>, vector<16x128xf32>,
    %c0_91 = arith.constant 0 : index
    %c0_92 = arith.constant 0 : index
    %106 = vector.load %arg12[%c0_91, %c0_92] : memref<128x128xf32, #tpu.memory_space<vmem>>, vector<128x128xf32>
    %cst_93 = arith.constant dense<0.000000e+00> : vector<16x128xf32>
    %107 = tpu.matmul %101, %106, %cst_93 {dimension_numbers = #tpu.dot_dimension_numbers<[1], [0], [0], [1], [0, 0, 1, 1], [], []>} : vector<16x128xf32>, vector<128x128xf32>, vector<16x128xf32> -> vector<16x128xf32>
    %c0_94 = arith.constant 0 : index
    %c0_95 = arith.constant 0 : index
    %108 = vector.load %arg13[%c0_94, %c0_95] : memref<128x128xf32, #tpu.memory_space<vmem>>, vector<128x128xf32>
    %cst_96 = arith.constant dense<0.000000e+00> : vector<16x128xf32>
    %109 = tpu.matmul %103, %108, %cst_96 {dimension_numbers = #tpu.dot_dimension_numbers<[1], [0], [0], [1], [0, 0, 1, 1], [], []>} : vector<16x128xf32>, vector<128x128xf32>, vector<16x128xf32> -> vector<16x128xf32>
    %110 = arith.addf %107, %109 : vector<16x128xf32>
    %c0_97 = arith.constant 0 : index
    %c0_98 = arith.constant 0 : index
    %111 = vector.load %arg14[%c0_97, %c0_98] : memref<1x128xf32, #tpu.memory_space<vmem>>, vector<1x128xf32>
    %112 = vector.broadcast %111 : vector<1x128xf32> to vector<16x128xf32>
    %113 = arith.addf %110, %112 : vector<16x128xf32>
    %c0_99 = arith.constant 0 : index
    %c0_100 = arith.constant 0 : index
    %114 = vector.load %arg15[%c0_99, %c0_100] : memref<16x128xf32, #tpu.memory_space<vmem>>, vector<16x128xf32>
    tpu.vector_store %arg15[%c0_99, %c0_100], %113 {strides = array<i32>} : memref<16x128xf32, #tpu.memory_space<vmem>>, vector<16x128xf32>,
    return
  }
}

</mosaic_0001>

<bundles_post_ra>
// kernel: tpu_custom_call.1
= control target key start
LH: loop header
LB: loop body
LE: loop exit
PB: predicated region body
PF: predicated region fallthrough
CT: control target
= control target key end

     0   :  { %s6034_s0 = inlined_call_operand.hbm [shape: bf16[128,128], index: 0, kind: input, shape index: {}]   ;;  %s6035_s1 = inlined_call_operand.hbm [shape: bf16[128,128], index: 1, kind: input, shape index: {}]   ;;  %s6036_s2 = inlined_call_operand.hbm [shape: bf16[128,128], index: 2, kind: input, shape index: {}]   ;;  %s6037_s3 = inlined_call_operand.hbm [shape: bf16[128,128], index: 3, kind: input, shape index: {}]   ;;  %s6038_s4 = inlined_call_operand.hbm [shape: bf16[3,128,128], index: 4, kind: input, shape index: {}]   ;;  %s6039_s5 = inlined_call_operand.hbm [shape: bf16[3,128,128], index: 5, kind: input, shape index: {}]   ;;  %s6040_s6 = inlined_call_operand.vmem [shape: f32[3,1,128], index: 6, kind: input, shape index: {}]   ;;  %s6041_s7 = inlined_call_operand.hbm [shape: bf16[3,128,128], index: 7, kind: input, shape index: {}]   ;;  %s6042_s8 = inlined_call_operand.hbm [shape: bf16[3,128,128], index: 8, kind: input, shape index: {}]   ;;  %s6043_s9 = inlined_call_operand.vmem [shape: f32[3,1,128], index: 9, kind: input, shape index: {}]   ;;  %s6044_s10 = inlined_call_operand.vmem [shape: bf16[16,128], index: 10, kind: input, shape index: {}]   ;;  %s6045_s11 = inlined_call_operand.vmem [shape: bf16[16,128], index: 11, kind: input, shape index: {}]   ;;  %s6046_s12 = inlined_call_operand.hbm [shape: f32[128,128], index: 12, kind: input, shape index: {}]   ;;  %s6047_s13 = inlined_call_operand.hbm [shape: f32[128,128], index: 13, kind: input, shape index: {}]   ;;  %s6048_s14 = inlined_call_operand.vmem [shape: f32[1,128], index: 14, kind: input, shape index: {}]   ;;  %s6049_s15 = inlined_call_operand.hbm [shape: f32[16,128], index: 15, kind: output, shape index: {0}]   ;;  %s6050_s16 = inlined_call_operand.hbm [shape: f32[16,256], index: 16, kind: output, shape index: {1}]  }
   0x1   :  { %6052 = sst [smem:[#allocation30_spill]] %s6034_s0 }
   0x2   :  { %22 = vsyncpa [#allocation3], 0 }
   0x3   :  { %23 = vsyncpa [#allocation6], 0 }
   0x4   :  { %24 = vsyncpa [#allocation9], 0 }
   0x5   :  { %25 = vsyncpa [#allocation12], 0 }
   0x6   :  { %26 = vsyncpa [#allocation15], 0 }
   0x7   :  { %27 = vsyncpa [#allocation18], 0 }
   0x8   :  { %28 = vsyncpa [#allocation4], 0 }
   0x9   :  { %29 = vsyncpa [#allocation21], 0  ;;  %s5413_s21 = smov [#allocation5]   ;;  %s5414_s23 = smov [#allocation8]  }
   0xa   :  { %s47_s22 = sshll.u32 %s5413_s21, 4  ;;  %s71_s24 = sshll.u32 %s5414_s23, 4  ;;  %s48_s22 = int_to_ptr.vmem [resolvable:$true] %s47_s22  ;;  %s5518_s24 = int_to_ptr.vmem [resolvable:$true] %s71_s24 }
   0xb   :  { %s5133_s27 = scalar_lea.hbm %s6035_s1, 1024 }
   0xc   :  { %p5134_p0 = scmp.ne.s32.totalorder %s6035_s1, %s5133_s27  ;;  %p5137_p1 = scmp.lt.u32.totalorder %s5133_s27, %s6035_s1 }
   0xe   :  { %p5139_p2 = pnand %p5137_p1, %p5134_p0 }
  0x10   :  { %5142 = shalt.err (!%p5139_p2)
}
  0x11   :  { %s5143_s17 = scalar_lea.vmem %s48_s22, 1024  ;;  %p5148_p4 = scmp.lt.s32.totalorder %s48_s22, %s48_s22 }
  0x12   :  { %p5144_p3 = scmp.ne.s32.totalorder %s48_s22, %s5143_s17  ;;  %p5149_p5 = scmp.lt.s32.totalorder %s5143_s17, %s5143_s17 }
  0x14   :  { %p5150_p6 = por %p5149_p5, %p5148_p4 }
  0x16   :  { %p5151_p7 = pnand %p5150_p6, %p5144_p3 }
  0x18   :  { %5154 = shalt.err (!%p5151_p7)
}
  0x19   :  { %s5415_s18 = smov 64   ;;  %s5416_s19 = smov 4  }
  0x1a   :  { %53 = dma.hbm_to_vmem [thread:$0]  %s6035_s1, 1024, %s48_s22, [#allocation6], %s5415_s18, %s5415_s18, %s5416_s19  }
  0x1b   :  { %s5155_s26 = scalar_lea.hbm %s6037_s3, 1024 }
  0x1c   :  { %p5156_p8 = scmp.ne.s32.totalorder %s6037_s3, %s5155_s26  ;;  %p5159_p9 = scmp.lt.u32.totalorder %s5155_s26, %s6037_s3 }
  0x1e   :  { %p5161_p10 = pnand %p5159_p9, %p5156_p8 }
  0x20   :  { %5164 = shalt.err (!%p5161_p10)
}
  0x21   :  { %s5165_s0 = scalar_lea.vmem %s5518_s24, 1024  ;;  %p5170_p12 = scmp.lt.s32.totalorder %s5518_s24, %s5518_s24 }
  0x22   :  { %p5166_p11 = scmp.ne.s32.totalorder %s5518_s24, %s5165_s0  ;;  %p5171_p13 = scmp.lt.s32.totalorder %s5165_s0, %s5165_s0 }
  0x24   :  { %p5172_p0 = por %p5171_p13, %p5170_p12 }
  0x26   :  { %p5173_p1 = pnand %p5172_p0, %p5166_p11 }
  0x28   :  { %5176 = shalt.err (!%p5173_p1)
}
  0x29   :  { %77 = dma.hbm_to_vmem [thread:$0]  %s6037_s3, 1024, %s5518_s24, [#allocation9], %s5415_s18, %s5415_s18, %s5416_s19  }
  0x2a   :  { %s5417_s17 = smov [#allocation11]   ;;  %s5418_s21 = smov [#allocation14]  }
  0x2b   :  { %s95_s20 = sshll.u32 %s5417_s17, 4  ;;  %s121_s23 = sshll.u32 %s5418_s21, 4  ;;  %s96_s20 = int_to_ptr.vmem [resolvable:$true] %s95_s20  ;;  %s5555_s23 = int_to_ptr.vmem [resolvable:$true] %s121_s23 }
  0x2c   :  { %s5177_s27 = scalar_lea.hbm %s6039_s5, 3072 }
  0x2d   :  { %p5178_p2 = scmp.ne.s32.totalorder %s6039_s5, %s5177_s27  ;;  %p5181_p3 = scmp.lt.u32.totalorder %s5177_s27, %s6039_s5 }
  0x2f   :  { %p5183_p4 = pnand %p5181_p3, %p5178_p2 }
  0x31   :  { %5186 = shalt.err (!%p5183_p4)
}
  0x32   :  { %s5187_s3 = scalar_lea.vmem %s96_s20, 3072  ;;  %p5192_p6 = scmp.lt.s32.totalorder %s96_s20, %s96_s20 }
  0x33   :  { %p5188_p5 = scmp.ne.s32.totalorder %s96_s20, %s5187_s3  ;;  %p5193_p7 = scmp.lt.s32.totalorder %s5187_s3, %s5187_s3 }
  0x35   :  { %p5194_p8 = por %p5193_p7, %p5192_p6 }
  0x37   :  { %p5195_p9 = pnand %p5194_p8, %p5188_p5 }
  0x39   :  { %5198 = shalt.err (!%p5195_p9)
}
  0x3a   :  { %101 = dma.hbm_to_vmem [thread:$0]  %s6039_s5, 3072, %s96_s20, [#allocation12], %s5415_s18, %s5415_s18, %s5416_s19  }
  0x3b   :  { %s5199_s21 = scalar_lea.hbm %s6042_s8, 3072 }
  0x3c   :  { %p5200_p10 = scmp.ne.s32.totalorder %s6042_s8, %s5199_s21  ;;  %p5203_p11 = scmp.lt.u32.totalorder %s5199_s21, %s6042_s8 }
  0x3e   :  { %p5205_p12 = pnand %p5203_p11, %p5200_p10 }
  0x40   :  { %5208 = shalt.err (!%p5205_p12)
}
  0x41   :  { %s5209_s29 = scalar_lea.vmem %s5555_s23, 3072  ;;  %p5214_p0 = scmp.lt.s32.totalorder %s5555_s23, %s5555_s23 }
  0x42   :  { %p5210_p13 = scmp.ne.s32.totalorder %s5555_s23, %s5209_s29  ;;  %p5215_p1 = scmp.lt.s32.totalorder %s5209_s29, %s5209_s29 }
  0x44   :  { %p5216_p2 = por %p5215_p1, %p5214_p0 }
  0x46   :  { %p5217_p3 = pnand %p5216_p2, %p5210_p13 }
  0x48   :  { %5220 = shalt.err (!%p5217_p3)
}
  0x49   :  { %127 = dma.hbm_to_vmem [thread:$0]  %s6042_s8, 3072, %s5555_s23, [#allocation15], %s5415_s18, %s5415_s18, %s5416_s19  }
  0x4a   :  { %s5419_s30 = smov [#allocation2]   ;;  %s5420_s3 = smov [#allocation7]  }
  0x4b   :  { %s35_s0 = sshll.u32 %s5419_s30, 4  ;;  %s59_s24 = sshll.u32 %s5420_s3, 4  ;;  %s36_s0 = int_to_ptr.vmem [resolvable:$true] %s35_s0  ;;  %s5592_s24 = int_to_ptr.vmem [resolvable:$true] %s59_s24 }
  0x4c   :  { %s6053_s17 = sld [smem:[#allocation30_spill]] }
  0x52   :  { %s5221_s21 = scalar_lea.hbm %s6053_s17, 1024 }
  0x53   :  { %p5222_p4 = scmp.ne.s32.totalorder %s6053_s17, %s5221_s21  ;;  %p5225_p5 = scmp.lt.u32.totalorder %s5221_s21, %s6053_s17 }
  0x55   :  { %p5227_p6 = pnand %p5225_p5, %p5222_p4 }
  0x57   :  { %5230 = shalt.err (!%p5227_p6)
}
  0x58   :  { %s5231_s8 = scalar_lea.vmem %s36_s0, 1024  ;;  %p5236_p8 = scmp.lt.s32.totalorder %s36_s0, %s36_s0 }
  0x59   :  { %p5232_p7 = scmp.ne.s32.totalorder %s36_s0, %s5231_s8  ;;  %p5237_p9 = scmp.lt.s32.totalorder %s5231_s8, %s5231_s8 }
  0x5b   :  { %p5238_p10 = por %p5237_p9, %p5236_p8 }
  0x5d   :  { %p5239_p11 = pnand %p5238_p10, %p5232_p7 }
  0x5f   :  { %5242 = shalt.err (!%p5239_p11)
}
  0x60   :  { %41 = dma.hbm_to_vmem [thread:$0]  %s6053_s17, 1024, %s36_s0, [#allocation3], %s5415_s18, %s5415_s18, %s5416_s19  }
  0x61   :  { %s5243_s30 = scalar_lea.hbm %s6036_s2, 1024 }
  0x62   :  { %p5244_p12 = scmp.ne.s32.totalorder %s6036_s2, %s5243_s30  ;;  %p5247_p13 = scmp.lt.u32.totalorder %s5243_s30, %s6036_s2 }
  0x64   :  { %p5249_p0 = pnand %p5247_p13, %p5244_p12 }
  0x66   :  { %5252 = shalt.err (!%p5249_p0)
}
  0x67   :  { %s5253_s25 = scalar_lea.vmem %s5592_s24, 1024  ;;  %p5258_p2 = scmp.lt.s32.totalorder %s5592_s24, %s5592_s24 }
  0x68   :  { %p5254_p1 = scmp.ne.s32.totalorder %s5592_s24, %s5253_s25  ;;  %p5259_p3 = scmp.lt.s32.totalorder %s5253_s25, %s5253_s25 }
  0x6a   :  { %p5260_p4 = por %p5259_p3, %p5258_p2 }
  0x6c   :  { %p5261_p5 = pnand %p5260_p4, %p5254_p1 }
  0x6e   :  { %5264 = shalt.err (!%p5261_p5)
}
  0x6f   :  { %65 = dma.hbm_to_vmem [thread:$0]  %s6036_s2, 1024, %s5592_s24, [#allocation6], %s5415_s18, %s5415_s18, %s5416_s19  }
  0x70   :  { %s5421_s26 = smov [#allocation10]   ;;  %s5422_s28 = smov [#allocation13]  }
  0x71   :  { %s83_s27 = sshll.u32 %s5421_s26, 4  ;;  %s109_s8 = sshll.u32 %s5422_s28, 4  ;;  %s84_s27 = int_to_ptr.vmem [resolvable:$true] %s83_s27  ;;  %s5629_s8 = int_to_ptr.vmem [resolvable:$true] %s109_s8 }
  0x72   :  { %s5265_s5 = scalar_lea.hbm %s6038_s4, 3072 }
  0x73   :  { %p5266_p6 = scmp.ne.s32.totalorder %s6038_s4, %s5265_s5  ;;  %p5269_p7 = scmp.lt.u32.totalorder %s5265_s5, %s6038_s4 }
  0x75   :  { %p5271_p8 = pnand %p5269_p7, %p5266_p6 }
  0x77   :  { %5274 = shalt.err (!%p5271_p8)
}
  0x78   :  { %s5275_s2 = scalar_lea.vmem %s84_s27, 3072  ;;  %p5280_p10 = scmp.lt.s32.totalorder %s84_s27, %s84_s27 }
  0x79   :  { %p5276_p9 = scmp.ne.s32.totalorder %s84_s27, %s5275_s2  ;;  %p5281_p11 = scmp.lt.s32.totalorder %s5275_s2, %s5275_s2 }
  0x7b   :  { %p5282_p12 = por %p5281_p11, %p5280_p10 }
  0x7d   :  { %p5283_p13 = pnand %p5282_p12, %p5276_p9 }
  0x7f   :  { %5286 = shalt.err (!%p5283_p13)
}
  0x80   :  { %89 = dma.hbm_to_vmem [thread:$0]  %s6038_s4, 3072, %s84_s27, [#allocation9], %s5415_s18, %s5415_s18, %s5416_s19  }
  0x81   :  { %s5287_s0 = scalar_lea.hbm %s6041_s7, 3072 }
  0x82   :  { %p5288_p0 = scmp.ne.s32.totalorder %s6041_s7, %s5287_s0  ;;  %p5291_p1 = scmp.lt.u32.totalorder %s5287_s0, %s6041_s7 }
  0x84   :  { %p5293_p2 = pnand %p5291_p1, %p5288_p0 }
  0x86   :  { %5296 = shalt.err (!%p5293_p2)
}
  0x87   :  { %s5297_s29 = scalar_lea.vmem %s5629_s8, 3072  ;;  %p5302_p4 = scmp.lt.s32.totalorder %s5629_s8, %s5629_s8 }
  0x88   :  { %p5298_p3 = scmp.ne.s32.totalorder %s5629_s8, %s5297_s29  ;;  %p5303_p5 = scmp.lt.s32.totalorder %s5297_s29, %s5297_s29 }
  0x8a   :  { %p5304_p6 = por %p5303_p5, %p5302_p4 }
  0x8c   :  { %p5305_p7 = pnand %p5304_p6, %p5298_p3 }
  0x8e   :  { %5308 = shalt.err (!%p5305_p7)
}
  0x8f   :  { %115 = dma.hbm_to_vmem [thread:$0]  %s6041_s7, 3072, %s5629_s8, [#allocation12], %s5415_s18, %s5415_s18, %s5416_s19  }
  0x90   :  { %s5423_s5 = smov [#allocation16]   ;;  %s5309_s1 = scalar_lea.hbm %s6046_s12, 2048 }
  0x91   :  { %s139_s20 = sshll.u32 %s5423_s5, 4  ;;  %p5310_p8 = scmp.ne.s32.totalorder %s6046_s12, %s5309_s1  ;;  %s140_s20 = int_to_ptr.vmem [resolvable:$true] %s139_s20 }
  0x92   :  { %p5313_p9 = scmp.lt.u32.totalorder %s5309_s1, %s6046_s12 }
  0x94   :  { %p5315_p10 = pnand %p5313_p9, %p5310_p8 }
  0x96   :  { %5318 = shalt.err (!%p5315_p10)
}
  0x97   :  { %s5319_s25 = scalar_lea.vmem %s140_s20, 2048  ;;  %p5324_p12 = scmp.lt.s32.totalorder %s140_s20, %s140_s20 }
  0x98   :  { %p5320_p11 = scmp.ne.s32.totalorder %s140_s20, %s5319_s25  ;;  %p5325_p13 = scmp.lt.s32.totalorder %s5319_s25, %s5319_s25 }
  0x9a   :  { %p5326_p0 = por %p5325_p13, %p5324_p12 }
  0x9c   :  { %p5327_p1 = pnand %p5326_p0, %p5320_p11 }
  0x9e   :  { %5330 = shalt.err (!%p5327_p1)
}
  0x9f   :  { %s5424_s7 = smov 128   ;;  %s5425_s18 = smov 8  }
  0xa0   :  { %145 = dma.hbm_to_vmem [thread:$0]  %s6046_s12, 2048, %s140_s20, [#allocation15], %s5424_s7, %s5424_s7, %s5425_s18  }
  0xa1   :  { %s5426_s0 = smov [#allocation17]   ;;  %s5331_s23 = scalar_lea.hbm %s6047_s13, 2048 }
  0xa2   :  { %s151_s17 = sshll.u32 %s5426_s0, 4  ;;  %p5332_p2 = scmp.ne.s32.totalorder %s6047_s13, %s5331_s23  ;;  %s152_s17 = int_to_ptr.vmem [resolvable:$true] %s151_s17 }
  0xa3   :  { %p5335_p3 = scmp.lt.u32.totalorder %s5331_s23, %s6047_s13 }
  0xa5   :  { %p5337_p4 = pnand %p5335_p3, %p5332_p2 }
  0xa7   :  { %5340 = shalt.err (!%p5337_p4)
}
  0xa8   :  { %s5341_s30 = scalar_lea.vmem %s152_s17, 2048  ;;  %p5346_p6 = scmp.lt.s32.totalorder %s152_s17, %s152_s17 }
  0xa9   :  { %p5342_p5 = scmp.ne.s32.totalorder %s152_s17, %s5341_s30  ;;  %p5347_p7 = scmp.lt.s32.totalorder %s5341_s30, %s5341_s30 }
  0xab   :  { %p5348_p8 = por %p5347_p7, %p5346_p6 }
  0xad   :  { %p5349_p9 = pnand %p5348_p8, %p5342_p5 }
  0xaf   :  { %5352 = shalt.err (!%p5349_p9)
}
  0xb0   :  { %157 = dma.hbm_to_vmem [thread:$0]  %s6047_s13, 2048, %s152_s17, [#allocation18], %s5424_s7, %s5424_s7, %s5425_s18  }
  0xb1   :  { %5397 = dma.done.wait [#allocation3], 1024  }
  0xb2   :  { %5398 = vsyncadd [#allocation3], 4294966272 }
  0xb3   :  { %5399 = dma.done.wait [#allocation6], 2048  }
  0xb4   :  { %5400 = vsyncadd [#allocation6], 4294965248 }
  0xb5   :  { %5401 = dma.done.wait [#allocation9], 4096  }
  0xb6   :  { %5402 = vsyncadd [#allocation9], 4294963200 }
  0xb7   :  { %5403 = dma.done.wait [#allocation12], 6144  }
  0xb8   :  { %5404 = vsyncadd [#allocation12], 4294961152 }
  0xb9   :  { %5405 = dma.done.wait [#allocation15], 5120  }
  0xba   :  { %5406 = vsyncadd [#allocation15], 4294962176 }
  0xbb   :  { %5407 = dma.done.wait [#allocation18], 2048  }
  0xbc   :  { %5408 = vsyncadd [#allocation18], 4294965248  ;;  %v4987_v0 = vld [vmem:[#allocation10] sm:$0xff]   ;;  %v4988_v1 = vld [vmem:[#allocation10 + $0x8] sm:$0xff]   ;;  %vm5428_vm0 = vmmov 0  }
  0xbd   :  { %4119 = vmatprep.subr.bf16.mxu0 %v4987_v0  ;;  %v4989_v2 = vld [vmem:[#allocation10 + $0x10] sm:$0xff]   ;;  %v4990_v3 = vld [vmem:[#allocation10 + $0x18] sm:$0xff]   ;;  %v5696_v4 = vld [vmem:[#allocation7] sm:$0xff]  }
  0xbe   :  { %4120 = vmatpush3.bf16.msra.mxu0 %v4987_v0  ;;  %4135 = vmatprep.mubr.bf16.mxu0 %v5696_v4  ;;  %v4991_v5 = vld [vmem:[#allocation10 + $0x20] sm:$0xff]   ;;  %v4992_v6 = vld [vmem:[#allocation10 + $0x28] sm:$0xff]   ;;  %v4993_v7 = vld [vmem:[#allocation10 + $0x30] sm:$0xff]  }
  0xbf   :  { %4121 = vmatprep.subr.bf16.mxu0 %v4988_v1  ;;  %v4994_v8 = vld [vmem:[#allocation10 + $0x38] sm:$0xff]   ;;  %v5011_v9 = vld [vmem:[#allocation8] sm:$0xff]   ;;  %v5699_v11 = vld [vmem:[#allocation7 + $0x8] sm:$0xff]  }
  0xc0   :  { %4167 = vmatprep.mubr.bf16.mxu1 %v5011_v9  ;;  %v4997_v10 = vld [vmem:[#allocation13] sm:$0xff]   ;;  %v4998_v12 = vld [vmem:[#allocation13 + $0x8] sm:$0xff]   ;;  %v5701_v13 = vld [vmem:[#allocation7 + $0x10] sm:$0xff]  }
  0xc1   :  { %v5019_v14 = vld [vmem:[#allocation11] sm:$0xff]   ;;  %v5020_v15 = vld [vmem:[#allocation11 + $0x8] sm:$0xff]   ;;  %v5705_v16 = vld [vmem:[#allocation7 + $0x18] sm:$0xff]  }
  0xc2   :  { %4122 = vmatpush3.bf16.msra.mxu0 %v4988_v1  ;;  %4151 = vmatprep.subr.bf16.mxu1 %v5019_v14  ;;  %v5001_v17 = vld [vmem:[#allocation13 + $0x10] sm:$0xff]   ;;  %v5002_v19 = vld [vmem:[#allocation13 + $0x18] sm:$0xff]   ;;  %v5707_v20 = vld [vmem:[#allocation7 + $0x20] sm:$0xff]  }
  0xc3   :  { %4123 = vmatprep.subr.bf16.mxu0 %v4989_v2  ;;  %4152 = vmatpush3.bf16.msra.mxu1 %v5019_v14  ;;  %v5021_v18 = vld [vmem:[#allocation11 + $0x10] sm:$0xff]   ;;  %v5022_v21 = vld [vmem:[#allocation11 + $0x18] sm:$0xff]   ;;  %v5005_v22 = vld [vmem:[#allocation13 + $0x20] sm:$0xff]  }
  0xc4   :  { %4153 = vmatprep.subr.bf16.mxu1 %v5020_v15  ;;  %v5023_v23 = vld [vmem:[#allocation11 + $0x20] sm:$0xff]   ;;  %v5711_v24 = vld [vmem:[#allocation7 + $0x28] sm:$0xff]   ;;  %v5713_v25 = vld [vmem:[#allocation7 + $0x30] sm:$0xff]  }
  0xc5   :  { %v5006_v26 = vld [vmem:[#allocation13 + $0x28] sm:$0xff]   ;;  %v5009_v28 = vld [vmem:[#allocation13 + $0x30] sm:$0xff]   ;;  %v5717_v30 = vld [vmem:[#allocation7 + $0x38] sm:$0xff]  }
  0xc6   :  { %4124 = vmatpush3.bf16.msra.mxu0 %v4989_v2  ;;  %v5024_v27 = vld [vmem:[#allocation11 + $0x28] sm:$0xff]   ;;  %v5025_v29 = vld [vmem:[#allocation11 + $0x30] sm:$0xff]   ;;  %v5010_v31 = vld [vmem:[#allocation13 + $0x38] sm:$0xff]  }
  0xc7   :  { %4125 = vmatprep.subr.bf16.mxu0 %v4990_v3  ;;  %4154 = vmatpush3.bf16.msra.mxu1 %v5020_v15  ;;  %v5012_v32 = vld [vmem:[#allocation8 + $0x8] sm:$0xff]   ;;  %v5013_v33 = vld [vmem:[#allocation8 + $0x10] sm:$0xff]   ;;  %v5014_v34 = vld [vmem:[#allocation8 + $0x18] sm:$0xff]  }
  0xc8   :  { %4155 = vmatprep.subr.bf16.mxu1 %v5021_v18  ;;  %v5015_v35 = vld [vmem:[#allocation8 + $0x20] sm:$0xff]   ;;  %v5016_v36 = vld [vmem:[#allocation8 + $0x28] sm:$0xff]   ;;  %v5017_v37 = vld [vmem:[#allocation8 + $0x30] sm:$0xff]  }
  0xc9   :  { %v5018_v38 = vld [vmem:[#allocation8 + $0x38] sm:$0xff]   ;;  %v5027_v40 = vld [vmem:[#allocation14] sm:$0xff]   ;;  %v5028_v41 = vld [vmem:[#allocation14 + $0x8] sm:$0xff]  }
  0xca   :  { %4126 = vmatpush3.bf16.msra.mxu0 %v4990_v3  ;;  %v5026_v39 = vld [vmem:[#allocation11 + $0x38] sm:$0xff]   ;;  %v5029_v42 = vld [vmem:[#allocation14 + $0x10] sm:$0xff]   ;;  %v5031_v44 = vld [vmem:[#allocation14 + $0x20] sm:$0xff]  }
  0xcb   :  { %4127 = vmatprep.subr.bf16.mxu0 %v4991_v5  ;;  %4156 = vmatpush3.bf16.msra.mxu1 %v5021_v18  ;;  %v5030_v43 = vld [vmem:[#allocation14 + $0x18] sm:$0xff]   ;;  %v5032_v45 = vld [vmem:[#allocation14 + $0x28] sm:$0xff]   ;;  %v5033_v46 = vld [vmem:[#allocation14 + $0x30] sm:$0xff]  }
  0xcc   :  { %4157 = vmatprep.subr.bf16.mxu1 %v5022_v21  ;;  %v5034_v47 = vld [vmem:[#allocation14 + $0x38] sm:$0xff]   ;;  %v5721_v48 = vld [vmem:[#allocation2] sm:$0xff]  }
  0xcd   :  { %v5731_v49 = vld [vmem:[#allocation5] sm:$0xff]  }
  0xce   :  { %4128 = vmatpush3.bf16.msra.mxu0 %v4991_v5 }
  0xcf   :  { %4129 = vmatprep.subr.bf16.mxu0 %v4992_v6  ;;  %4158 = vmatpush3.bf16.msra.mxu1 %v5022_v21  ;;  %v5740_v21 = vld [vmem:[#allocation2 + $0x18] sm:$0xff]  }
  0xd0   :  { %4159 = vmatprep.subr.bf16.mxu1 %v5023_v23 }
  0xd2   :  { %4130 = vmatpush3.bf16.msra.mxu0 %v4992_v6 }
  0xd3   :  { %4131 = vmatprep.subr.bf16.mxu0 %v4993_v7  ;;  %4160 = vmatpush3.bf16.msra.mxu1 %v5023_v23 }
  0xd4   :  { %4161 = vmatprep.subr.bf16.mxu1 %v5024_v27 }
  0xd6   :  { %4132 = vmatpush3.bf16.msra.mxu0 %v4993_v7 }
  0xd7   :  { %4133 = vmatprep.subr.bf16.mxu0 %v4994_v8  ;;  %4162 = vmatpush3.bf16.msra.mxu1 %v5024_v27 }
  0xd8   :  { %4163 = vmatprep.subr.bf16.mxu1 %v5025_v29 }
  0xda   :  { %4134 = vmatpush3.bf16.msra.mxu0 %v4994_v8 }
  0xdb   :  { %4215 = vmatprep.subr.bf16.mxu0 %v4997_v10  ;;  %4164 = vmatpush3.bf16.msra.mxu1 %v5025_v29  ;;  %v5746_v29 = vld [vmem:[#allocation2 + $0x28] sm:$0xff]  }
  0xdc   :  { %4165 = vmatprep.subr.bf16.mxu1 %v5026_v39 }
  0xdd   :  { %4136 = vmatmul.mubr.bf16.vlgmr.msra.gmra.mrb[0].mxu0 %v5699_v11 }
  0xde   :  { %4216 = vmatpush3.bf16.msra.mxu0 %v4997_v10  ;;  %4139 = vmatprep.mubr.bf16.mxu0 %v5701_v13 }
  0xdf   :  { %4217 = vmatprep.subr.bf16.mxu0 %v4998_v12  ;;  %4166 = vmatpush3.bf16.msra.mxu1 %v5026_v39 }
  0xe2   :  { %4218 = vmatpush3.bf16.msra.mxu0 %v4998_v12  ;;  %4168 = vmatmul.mubr.bf16.vlgmr.msra.gmra.mrb[0].mxu1 %v5012_v32 }
  0xe3   :  { %4219 = vmatprep.subr.bf16.mxu0 %v5001_v17  ;;  %4171 = vmatprep.mubr.bf16.mxu1 %v5013_v33 }
  0xe5   :  { %4140 = vmatmul.mubr.bf16.gmra.mrb[4].mxu0 %v5705_v16 }
  0xe6   :  { %4220 = vmatpush3.bf16.msra.mxu0 %v5001_v17  ;;  %4143 = vmatprep.mubr.bf16.mxu0 %v5707_v20 }
  0xe7   :  { %4221 = vmatprep.subr.bf16.mxu0 %v5002_v19 }
  0xea   :  { %4222 = vmatpush3.bf16.msra.mxu0 %v5002_v19  ;;  %4172 = vmatmul.mubr.bf16.gmra.mrb[4].mxu1 %v5014_v34 }
  0xeb   :  { %4223 = vmatprep.subr.bf16.mxu0 %v5005_v22  ;;  %4175 = vmatprep.mubr.bf16.mxu1 %v5015_v35 }
  0xed   :  { %4144 = vmatmul.mubr.bf16.gmra.mrb[8].mxu0 %v5711_v24 }
  0xee   :  { %4224 = vmatpush3.bf16.msra.mxu0 %v5005_v22  ;;  %4147 = vmatprep.mubr.bf16.mxu0 %v5713_v25 }
  0xef   :  { %4225 = vmatprep.subr.bf16.mxu0 %v5006_v26 }
  0xf2   :  { %4226 = vmatpush3.bf16.msra.mxu0 %v5006_v26  ;;  %4176 = vmatmul.mubr.bf16.gmra.mrb[8].mxu1 %v5016_v36 }
  0xf3   :  { %4227 = vmatprep.subr.bf16.mxu0 %v5009_v28  ;;  %4179 = vmatprep.mubr.bf16.mxu1 %v5017_v37 }
  0xf5   :  { %4148 = vmatmul.mubr.bf16.gmra.mrb[12].mxu0 %v5717_v30 }
  0xf6   :  { %4228 = vmatpush3.bf16.msra.mxu0 %v5009_v28  ;;  %4231 = vmatprep.mubr.bf16.mxu0 %v5011_v9 }
  0xf7   :  { %4229 = vmatprep.subr.bf16.mxu0 %v5010_v31 }
  0xfa   :  { %4230 = vmatpush3.bf16.msra.mxu0 %v5010_v31  ;;  %4180 = vmatmul.mubr.bf16.gmra.mrb[12].mxu1 %v5018_v38 }
  0xfb   :  { %4247 = vmatprep.subr.bf16.mxu0 %v5027_v40  ;;  %4199 = vmatprep.mubr.bf16.mxu1 %v5721_v48 }
  0xfd   :  { %4232 = vmatmul.mubr.bf16.vlgmr.msra.gmra.mrb[16].mxu0 %v5012_v32  ;;  %v5748_v32 = vld [vmem:[#allocation2 + $0x30] sm:$0xff]  }
  0xfe   :  { %4235 = vmatprep.mubr.bf16.mxu0 %v5013_v33  ;;  %4248 = vmatpush3.bf16.msra.mxu0 %v5027_v40 }
  0xff   :  { %4249 = vmatprep.subr.bf16.mxu0 %v5028_v41 }
 0x102   :  { %4250 = vmatpush3.bf16.msra.mxu0 %v5028_v41  ;;  %v5051_v41 = vld [vmem:[#allocation13 + $0x40] sm:$0xff]  }
 0x103   :  { %4251 = vmatprep.subr.bf16.mxu0 %v5029_v42 }
 0x105   :  { %4236 = vmatmul.mubr.bf16.gmra.mrb[20].mxu0 %v5014_v34 }
 0x106   :  { %4239 = vmatprep.mubr.bf16.mxu0 %v5015_v35  ;;  %4252 = vmatpush3.bf16.msra.mxu0 %v5029_v42  ;;  %v5755_v42 = vld [vmem:[#allocation5 + $0x8] sm:$0xff]  }
 0x107   :  { %4253 = vmatprep.subr.bf16.mxu0 %v5030_v43 }
 0x10a   :  { %4254 = vmatpush3.bf16.msra.mxu0 %v5030_v43  ;;  %v5757_v43 = vld [vmem:[#allocation5 + $0x10] sm:$0xff]  }
 0x10b   :  { %4255 = vmatprep.subr.bf16.mxu0 %v5031_v44 }
 0x10d   :  { %4240 = vmatmul.mubr.bf16.gmra.mrb[24].mxu0 %v5016_v36 }
 0x10e   :  { %4243 = vmatprep.mubr.bf16.mxu0 %v5017_v37  ;;  %4256 = vmatpush3.bf16.msra.mxu0 %v5031_v44  ;;  %v5752_v37 = vld [vmem:[#allocation2 + $0x38] sm:$0xff]   ;;  %v5052_v44 = vld [vmem:[#allocation13 + $0x48] sm:$0xff]  }
 0x10f   :  { %4257 = vmatprep.subr.bf16.mxu0 %v5032_v45 }
 0x112   :  { %4258 = vmatpush3.bf16.msra.mxu0 %v5032_v45  ;;  %v5053_v45 = vld [vmem:[#allocation13 + $0x50] sm:$0xff]  }
 0x113   :  { %4259 = vmatprep.subr.bf16.mxu0 %v5033_v46 }
 0x115   :  { %4244 = vmatmul.mubr.bf16.gmra.mrb[28].mxu0 %v5018_v38 }
 0x116   :  { %4263 = vmatprep.mubr.bf16.mxu0 %v5696_v4  ;;  %4260 = vmatpush3.bf16.msra.mxu0 %v5033_v46  ;;  %v5761_v46 = vld [vmem:[#allocation5 + $0x18] sm:$0xff]  }
 0x117   :  { %4261 = vmatprep.subr.bf16.mxu0 %v5034_v47 }
 0x11a   :  { %4262 = vmatpush3.bf16.msra.mxu0 %v5034_v47  ;;  %v5763_v47 = vld [vmem:[#allocation5 + $0x20] sm:$0xff]  }
 0x11d   :  { %4264 = vmatmul.mubr.bf16.vlgmr.msra.gmra.mrb[32].mxu0 %v5699_v11 }
 0x11e   :  { %4267 = vmatprep.mubr.bf16.mxu0 %v5701_v13  ;;  %v5734_v13 = vld [vmem:[#allocation2 + $0x8] sm:$0xff]  }
 0x125   :  { %4268 = vmatmul.mubr.bf16.gmra.mrb[36].mxu0 %v5705_v16  ;;  %v5736_v16 = vld [vmem:[#allocation2 + $0x10] sm:$0xff]  }
 0x126   :  { %4271 = vmatprep.mubr.bf16.mxu0 %v5707_v20 }
 0x12d   :  { %4272 = vmatmul.mubr.bf16.gmra.mrb[40].mxu0 %v5711_v24  ;;  %v5742_v24 = vld [vmem:[#allocation2 + $0x20] sm:$0xff]  }
 0x12e   :  { %4275 = vmatprep.mubr.bf16.mxu0 %v5713_v25 }
 0x135   :  { %4276 = vmatmul.mubr.bf16.gmra.mrb[44].mxu0 %v5717_v30 }
 0x136   :  { %4295 = vmatprep.mubr.bf16.mxu0 %v5731_v49 }
 0x1b0   :  { %v4137_v50 = vpop.f32.mrb[0].mxu0 }
 0x1b1   :  { %v418_v51 = vpop.f32.mrb[1].mxu0 }
 0x1b2   :  { %v4138_v52 = vpop.f32.mrb[2].mxu0 }
 0x1b3   :  { %v482_v53 = vpack.c.bf16 %v4138_v52, %v4137_v50  ;;  %v421_v54 = vpop.f32.mrb[3].mxu0  ;;  %v5054_v50 = vld [vmem:[#allocation13 + $0x58] sm:$0xff]   ;;  %v5767_v52 = vld [vmem:[#allocation5 + $0x28] sm:$0xff]  }
 0x1b4   :  { %v481_v55 = vpack.c.bf16 %v421_v54, %v418_v51  ;;  %v5055_v51 = vld [vmem:[#allocation13 + $0x60] sm:$0xff]   ;;  %v5056_v54 = vld [vmem:[#allocation13 + $0x68] sm:$0xff]  }
 0x1b6   :  { %4183 = vmatprep.subr.bf16.mxu1 %v481_v55 }
 0x1b7   :  { %4184 = vmatpush3.bf16.msra.mxu1 %v481_v55  ;;  %v5773_v55 = vld [vmem:[#allocation5 + $0x38] sm:$0xff]  }
 0x1b8   :  { %v4141_v56 = vpop.f32.mrb[4].mxu0  ;;  %4185 = vmatprep.subr.bf16.mxu1 %v482_v53 }
 0x1b9   :  { %v434_v57 = vpop.f32.mrb[5].mxu0 }
 0x1ba   :  { %v4142_v58 = vpop.f32.mrb[6].mxu0 }
 0x1bb   :  { %v484_v59 = vpack.c.bf16 %v4142_v58, %v4141_v56  ;;  %v437_v60 = vpop.f32.mrb[7].mxu0  ;;  %4186 = vmatpush3.bf16.msra.mxu1 %v482_v53  ;;  %v5769_v53 = vld [vmem:[#allocation5 + $0x30] sm:$0xff]   ;;  %v5059_v58 = vld [vmem:[#allocation10 + $0x40] sm:$0xff]  }
 0x1bc   :  { %v483_v61 = vpack.c.bf16 %v437_v60, %v434_v57  ;;  %v5057_v56 = vld [vmem:[#allocation13 + $0x70] sm:$0xff]   ;;  %v5058_v57 = vld [vmem:[#allocation13 + $0x78] sm:$0xff]   ;;  %v5061_v60 = vld [vmem:[#allocation10 + $0x48] sm:$0xff]  }
 0x1be   :  { %4187 = vmatprep.subr.bf16.mxu1 %v483_v61 }
 0x1bf   :  { %4188 = vmatpush3.bf16.msra.mxu1 %v483_v61  ;;  %v5063_v61 = vld [vmem:[#allocation10 + $0x50] sm:$0xff]  }
 0x1c0   :  { %v4145_v62 = vpop.f32.mrb[8].mxu0  ;;  %4189 = vmatprep.subr.bf16.mxu1 %v484_v59 }
 0x1c1   :  { %v450_v63 = vpop.f32.mrb[9].mxu0 }
 0x1c2   :  { %v4146_v0 = vpop.f32.mrb[10].mxu0 }
 0x1c3   :  { %v486_v1 = vpack.c.bf16 %v4146_v0, %v4145_v62  ;;  %v453_v2 = vpop.f32.mrb[11].mxu0  ;;  %4190 = vmatpush3.bf16.msra.mxu1 %v484_v59  ;;  %v5060_v59 = vld [vmem:[#allocation14 + $0x40] sm:$0xff]   ;;  %v5065_v62 = vld [vmem:[#allocation10 + $0x58] sm:$0xff]   ;;  %v5069_v0 = vld [vmem:[#allocation10 + $0x68] sm:$0xff]  }
 0x1c4   :  { %v485_v3 = vpack.c.bf16 %v453_v2, %v450_v63  ;;  %v5067_v63 = vld [vmem:[#allocation10 + $0x60] sm:$0xff]   ;;  %v5073_v2 = vld [vmem:[#allocation10 + $0x78] sm:$0xff]  }
 0x1c6   :  { %4191 = vmatprep.subr.bf16.mxu1 %v485_v3 }
 0x1c7   :  { %4192 = vmatpush3.bf16.msra.mxu1 %v485_v3  ;;  %v5776_v3 = vld [vmem:[#allocation11 + $0x40] sm:$0xff]  }
 0x1c8   :  { %v4149_v4 = vpop.f32.mrb[12].mxu0  ;;  %4193 = vmatprep.subr.bf16.mxu1 %v486_v1 }
 0x1c9   :  { %v466_v5 = vpop.f32.mrb[13].mxu0 }
 0x1ca   :  { %v4150_v6 = vpop.f32.mrb[14].mxu0 }
 0x1cb   :  { %v488_v7 = vpack.c.bf16 %v4150_v6, %v4149_v4  ;;  %v469_v8 = vpop.f32.mrb[15].mxu0  ;;  %4194 = vmatpush3.bf16.msra.mxu1 %v486_v1  ;;  %v5071_v1 = vld [vmem:[#allocation10 + $0x70] sm:$0xff]   ;;  %v5782_v4 = vld [vmem:[%s6040_s6] ss:$0 sm:$0xff] }
 0x1cc   :  { %v487_v9 = vpack.c.bf16 %v469_v8, %v466_v5 }
 0x1ce   :  { %4195 = vmatprep.subr.bf16.mxu1 %v487_v9 }
 0x1cf   :  { %4196 = vmatpush3.bf16.msra.mxu1 %v487_v9 }
 0x1d0   :  { %4197 = vmatprep.subr.bf16.mxu1 %v488_v7  ;;  %v4233_v10 = vpop.f32.mrb[16].mxu0 }
 0x1d1   :  { %v988_v11 = vpop.f32.mrb[17].mxu0 }
 0x1d2   :  { %v4234_v12 = vpop.f32.mrb[18].mxu0 }
 0x1d3   :  { %v1052_v14 = vpack.c.bf16 %v4234_v12, %v4233_v10  ;;  %4198 = vmatpush3.bf16.msra.mxu1 %v488_v7  ;;  %v991_v15 = vpop.f32.mrb[19].mxu0 }
 0x1d4   :  { %v1051_v17 = vpack.c.bf16 %v991_v15, %v988_v11  ;;  %4311 = vmatprep.subr.bf16.mxu1 %v5059_v58 }
 0x1d6   :  { %4200 = vmatmul.mubr.bf16.vlgmr.msra.gmra.mrb[0].mxu1 %v5734_v13  ;;  %4279 = vmatprep.subr.bf16.mxu0 %v1051_v17 }
 0x1d7   :  { %4280 = vmatpush3.bf16.msra.mxu0 %v1051_v17  ;;  %4203 = vmatprep.mubr.bf16.mxu1 %v5736_v16 }
 0x1d8   :  { %v4237_v18 = vpop.f32.mrb[20].mxu0  ;;  %4281 = vmatprep.subr.bf16.mxu0 %v1052_v14  ;;  %4312 = vmatpush3.bf16.msra.mxu1 %v5059_v58 }
 0x1d9   :  { %v1004_v19 = vpop.f32.mrb[21].mxu0  ;;  %4313 = vmatprep.subr.bf16.mxu1 %v5061_v60 }
 0x1da   :  { %v4238_v20 = vpop.f32.mrb[22].mxu0 }
 0x1db   :  { %v1054_v22 = vpack.c.bf16 %v4238_v20, %v4237_v18  ;;  %v1007_v23 = vpop.f32.mrb[23].mxu0  ;;  %4282 = vmatpush3.bf16.msra.mxu0 %v1052_v14 }
 0x1dc   :  { %v1053_v25 = vpack.c.bf16 %v1007_v23, %v1004_v19  ;;  %4314 = vmatpush3.bf16.msra.mxu1 %v5061_v60 }
 0x1dd   :  { %4315 = vmatprep.subr.bf16.mxu1 %v5063_v61 }
 0x1de   :  { %4204 = vmatmul.mubr.bf16.gmra.mrb[4].mxu1 %v5740_v21  ;;  %4283 = vmatprep.subr.bf16.mxu0 %v1053_v25 }
 0x1df   :  { %4284 = vmatpush3.bf16.msra.mxu0 %v1053_v25  ;;  %4207 = vmatprep.mubr.bf16.mxu1 %v5742_v24 }
 0x1e0   :  { %v4241_v26 = vpop.f32.mrb[24].mxu0  ;;  %4285 = vmatprep.subr.bf16.mxu0 %v1054_v22  ;;  %4316 = vmatpush3.bf16.msra.mxu1 %v5063_v61 }
 0x1e1   :  { %v1020_v27 = vpop.f32.mrb[25].mxu0  ;;  %4317 = vmatprep.subr.bf16.mxu1 %v5065_v62 }
 0x1e2   :  { %v4242_v28 = vpop.f32.mrb[26].mxu0 }
 0x1e3   :  { %v1056_v30 = vpack.c.bf16 %v4242_v28, %v4241_v26  ;;  %v1023_v31 = vpop.f32.mrb[27].mxu0  ;;  %4286 = vmatpush3.bf16.msra.mxu0 %v1054_v22  ;;  %v5062_v26 = vld [vmem:[#allocation14 + $0x48] sm:$0xff]  }
 0x1e4   :  { %v1055_v33 = vpack.c.bf16 %v1023_v31, %v1020_v27  ;;  %4318 = vmatpush3.bf16.msra.mxu1 %v5065_v62 }
 0x1e5   :  { %4319 = vmatprep.subr.bf16.mxu1 %v5067_v63 }
 0x1e6   :  { %4208 = vmatmul.mubr.bf16.gmra.mrb[8].mxu1 %v5746_v29  ;;  %4287 = vmatprep.subr.bf16.mxu0 %v1055_v33 }
 0x1e7   :  { %4288 = vmatpush3.bf16.msra.mxu0 %v1055_v33  ;;  %4211 = vmatprep.mubr.bf16.mxu1 %v5748_v32 }
 0x1e8   :  { %v4245_v34 = vpop.f32.mrb[28].mxu0  ;;  %4289 = vmatprep.subr.bf16.mxu0 %v1056_v30  ;;  %4320 = vmatpush3.bf16.msra.mxu1 %v5067_v63  ;;  %v5068_v63 = vld [vmem:[#allocation14 + $0x60] sm:$0xff]  }
 0x1e9   :  { %v1036_v35 = vpop.f32.mrb[29].mxu0  ;;  %4321 = vmatprep.subr.bf16.mxu1 %v5069_v0 }
 0x1ea   :  { %v4246_v36 = vpop.f32.mrb[30].mxu0 }
 0x1eb   :  { %v1058_v38 = vpack.c.bf16 %v4246_v36, %v4245_v34  ;;  %v1039_v39 = vpop.f32.mrb[31].mxu0  ;;  %4290 = vmatpush3.bf16.msra.mxu0 %v1056_v30 }
 0x1ec   :  { %v1057_v40 = vpack.c.bf16 %v1039_v39, %v1036_v35  ;;  %4322 = vmatpush3.bf16.msra.mxu1 %v5069_v0 }
 0x1ed   :  { %4323 = vmatprep.subr.bf16.mxu1 %v5071_v1 }
 0x1ee   :  { %4212 = vmatmul.mubr.bf16.gmra.mrb[12].mxu1 %v5752_v37  ;;  %4291 = vmatprep.subr.bf16.mxu0 %v1057_v40 }
 0x1ef   :  { %4292 = vmatpush3.bf16.msra.mxu0 %v1057_v40 }
 0x1f0   :  { %4293 = vmatprep.subr.bf16.mxu0 %v1058_v38  ;;  %4324 = vmatpush3.bf16.msra.mxu1 %v5071_v1 }
 0x1f1   :  { %4325 = vmatprep.subr.bf16.mxu1 %v5073_v2 }
 0x1f3   :  { %4294 = vmatpush3.bf16.msra.mxu0 %v1058_v38  ;;  %v5064_v38 = vld [vmem:[#allocation14 + $0x50] sm:$0xff]  }
 0x1f4   :  { %4407 = vmatprep.subr.bf16.mxu0 %v5051_v41  ;;  %4326 = vmatpush3.bf16.msra.mxu1 %v5073_v2 }
 0x1f5   :  { %4343 = vmatprep.subr.bf16.mxu1 %v5776_v3 }
 0x1f6   :  { %4296 = vmatmul.mubr.bf16.vlgmr.msra.gmra.mrb[32].mxu0 %v5755_v42 }
 0x1f7   :  { %4299 = vmatprep.mubr.bf16.mxu0 %v5757_v43  ;;  %4408 = vmatpush3.bf16.msra.mxu0 %v5051_v41 }
 0x1f8   :  { %4409 = vmatprep.subr.bf16.mxu0 %v5052_v44 }
 0x1fb   :  { %4410 = vmatpush3.bf16.msra.mxu0 %v5052_v44 }
 0x1fc   :  { %4411 = vmatprep.subr.bf16.mxu0 %v5053_v45 }
 0x1fe   :  { %4300 = vmatmul.mubr.bf16.gmra.mrb[36].mxu0 %v5761_v46 }
 0x1ff   :  { %4303 = vmatprep.mubr.bf16.mxu0 %v5763_v47  ;;  %4412 = vmatpush3.bf16.msra.mxu0 %v5053_v45 }
 0x200   :  { %4413 = vmatprep.subr.bf16.mxu0 %v5054_v50 }
 0x203   :  { %4414 = vmatpush3.bf16.msra.mxu0 %v5054_v50 }
 0x204   :  { %4415 = vmatprep.subr.bf16.mxu0 %v5055_v51 }
 0x206   :  { %4304 = vmatmul.mubr.bf16.gmra.mrb[40].mxu0 %v5767_v52 }
 0x207   :  { %4307 = vmatprep.mubr.bf16.mxu0 %v5769_v53  ;;  %4416 = vmatpush3.bf16.msra.mxu0 %v5055_v51  ;;  %v5066_v51 = vld [vmem:[#allocation14 + $0x58] sm:$0xff]  }
 0x208   :  { %4417 = vmatprep.subr.bf16.mxu0 %v5056_v54 }
 0x20b   :  { %4418 = vmatpush3.bf16.msra.mxu0 %v5056_v54 }
 0x20c   :  { %4419 = vmatprep.subr.bf16.mxu0 %v5057_v56 }
 0x20e   :  { %4308 = vmatmul.mubr.bf16.gmra.mrb[44].mxu0 %v5773_v55 }
 0x20f   :  { %4420 = vmatpush3.bf16.msra.mxu0 %v5057_v56 }
 0x210   :  { %4421 = vmatprep.subr.bf16.mxu0 %v5058_v57 }
 0x213   :  { %4422 = vmatpush3.bf16.msra.mxu0 %v5058_v57 }
 0x214   :  { %4439 = vmatprep.subr.bf16.mxu0 %v5060_v59 }
 0x2a9   :  { %v4201_v5 = vpop.f32.mrb[0].mxu1 }
 0x2aa   :  { %v835_v6 = vadd.f32 %v4201_v5, %v5782_v4  ;;  %v764_v7 = vpop.f32.mrb[1].mxu1 }
 0x2ab   :  { %v833_v8 = vadd.f32 %v5782_v4, %v764_v7  ;;  %v4202_v9 = vpop.f32.mrb[2].mxu1 }
 0x2ac   :  { %v851_v10 = vmax.f32 %v835_v6, 0.0  ;;  %v836_v11 = vadd.f32 %v4202_v9, %v5782_v4  ;;  %v767_v12 = vpop.f32.mrb[3].mxu1 }
 0x2ad   :  { %v849_v14 = vmax.f32 %v833_v8, 0.0  ;;  %v834_v15 = vadd.f32 %v5782_v4, %v767_v12  ;;  %v5070_v8 = vld [vmem:[#allocation14 + $0x68] sm:$0xff]  }
 0x2ae   :  { %v852_v17 = vmax.f32 %v836_v11, 0.0 }
 0x2af   :  { %v850_v18 = vmax.f32 %v834_v15, 0.0 }
 0x2b0   :  { %v5788_v19 = vpack.c.bf16 %v852_v17, %v851_v10 }
 0x2b1   :  { %v5790_v20 = vpack.c.bf16 %v850_v18, %v849_v14  ;;  %v4205_v22 = vpop.f32.mrb[4].mxu1 }
 0x2b2   :  { %v839_v23 = vadd.f32 %v4205_v22, %v5782_v4  ;;  %v780_v25 = vpop.f32.mrb[5].mxu1  ;;  %v5072_v22 = vld [vmem:[#allocation14 + $0x70] sm:$0xff]  }
 0x2b3   :  { %v837_v27 = vadd.f32 %v5782_v4, %v780_v25  ;;  %v4206_v28 = vpop.f32.mrb[6].mxu1  ;;  %4423 = vmatprep.mubr.bf16.mxu0 %v5790_v20  ;;  %v5821_v25 = vld [vmem:[%s6043_s9] ss:$0 sm:$0xff] }
 0x2b4   :  { %v855_v30 = vmax.f32 %v839_v23, 0.0  ;;  %v840_v31 = vadd.f32 %v4206_v28, %v5782_v4  ;;  %v783_v33 = vpop.f32.mrb[7].mxu1  ;;  %4424 = vmatmul.mubr.bf16.vlgmr.msra.gmra.mrb[48].mxu0 %v5788_v19 }
 0x2b5   :  { %v853_v34 = vmax.f32 %v837_v27, 0.0  ;;  %v838_v35 = vadd.f32 %v5782_v4, %v783_v33  ;;  %4440 = vmatpush3.bf16.msra.mxu0 %v5060_v59 }
 0x2b6   :  { %v856_v36 = vmax.f32 %v840_v31, 0.0  ;;  %4441 = vmatprep.subr.bf16.mxu0 %v5062_v26 }
 0x2b7   :  { %v854_v39 = vmax.f32 %v838_v35, 0.0 }
 0x2b8   :  { %v5798_v40 = vpack.c.bf16 %v856_v36, %v855_v30 }
 0x2b9   :  { %v5800_v41 = vpack.c.bf16 %v854_v39, %v853_v34  ;;  %v4209_v44 = vpop.f32.mrb[8].mxu1  ;;  %4442 = vmatpush3.bf16.msra.mxu0 %v5062_v26 }
 0x2ba   :  { %v843_v45 = vadd.f32 %v4209_v44, %v5782_v4  ;;  %v796_v50 = vpop.f32.mrb[9].mxu1  ;;  %4443 = vmatprep.subr.bf16.mxu0 %v5064_v38 }
 0x2bb   :  { %v841_v54 = vadd.f32 %v5782_v4, %v796_v50  ;;  %v4210_v56 = vpop.f32.mrb[10].mxu1  ;;  %4427 = vmatprep.mubr.bf16.mxu0 %v5800_v41 }
 0x2bc   :  { %v859_v57 = vmax.f32 %v843_v45, 0.0  ;;  %v844_v58 = vadd.f32 %v4210_v56, %v5782_v4  ;;  %v799_v59 = vpop.f32.mrb[11].mxu1  ;;  %4428 = vmatmul.mubr.bf16.gmra.mrb[52].mxu0 %v5798_v40 }
 0x2bd   :  { %v857_v60 = vmax.f32 %v841_v54, 0.0  ;;  %v842_v61 = vadd.f32 %v5782_v4, %v799_v59  ;;  %4444 = vmatpush3.bf16.msra.mxu0 %v5064_v38  ;;  %v5076_v59 = vld [vmem:[#allocation11 + $0x48] sm:$0xff]  }
 0x2be   :  { %v860_v62 = vmax.f32 %v844_v58, 0.0  ;;  %4445 = vmatprep.subr.bf16.mxu0 %v5066_v51 }
 0x2bf   :  { %v858_v0 = vmax.f32 %v842_v61, 0.0 }
 0x2c0   :  { %v5808_v1 = vpack.c.bf16 %v860_v62, %v859_v57 }
 0x2c1   :  { %v5810_v2 = vpack.c.bf16 %v858_v0, %v857_v60  ;;  %v4213_v5 = vpop.f32.mrb[12].mxu1  ;;  %4446 = vmatpush3.bf16.msra.mxu0 %v5066_v51 }
 0x2c2   :  { %v847_v6 = vadd.f32 %v4213_v5, %v5782_v4  ;;  %v812_v7 = vpop.f32.mrb[13].mxu1  ;;  %4447 = vmatprep.subr.bf16.mxu0 %v5068_v63 }
 0x2c3   :  { %v845_v9 = vadd.f32 %v5782_v4, %v812_v7  ;;  %v4214_v10 = vpop.f32.mrb[14].mxu1  ;;  %4431 = vmatprep.mubr.bf16.mxu0 %v5810_v2  ;;  %v5077_v7 = vld [vmem:[#allocation11 + $0x50] sm:$0xff]  }
 0x2c4   :  { %v863_v11 = vmax.f32 %v847_v6, 0.0  ;;  %v848_v12 = vadd.f32 %v4214_v10, %v5782_v4  ;;  %v815_v14 = vpop.f32.mrb[15].mxu1  ;;  %4432 = vmatmul.mubr.bf16.gmra.mrb[56].mxu0 %v5808_v1 }
 0x2c5   :  { %v861_v15 = vmax.f32 %v845_v9, 0.0  ;;  %v846_v17 = vadd.f32 %v5782_v4, %v815_v14  ;;  %4448 = vmatpush3.bf16.msra.mxu0 %v5068_v63  ;;  %v5074_v4 = vld [vmem:[#allocation14 + $0x78] sm:$0xff]  }
 0x2c6   :  { %v864_v18 = vmax.f32 %v848_v12, 0.0  ;;  %4449 = vmatprep.subr.bf16.mxu0 %v5070_v8 }
 0x2c7   :  { %v862_v23 = vmax.f32 %v846_v17, 0.0  ;;  %v5078_v17 = vld [vmem:[#allocation11 + $0x58] sm:$0xff]  }
 0x2c8   :  { %v5823_v26 = vpack.c.bf16 %v864_v18, %v863_v11 }
 0x2c9   :  { %v5825_v27 = vpack.c.bf16 %v862_v23, %v861_v15  ;;  %v4297_v28 = vpop.f32.mrb[32].mxu0  ;;  %4450 = vmatpush3.bf16.msra.mxu0 %v5070_v8 }
 0x2ca   :  { %v1357_v30 = vadd.f32 %v4297_v28, %v5821_v25  ;;  %v1286_v31 = vpop.f32.mrb[33].mxu0  ;;  %4451 = vmatprep.subr.bf16.mxu0 %v5072_v22 }
 0x2cb   :  { %v1355_v33 = vadd.f32 %v5821_v25, %v1286_v31  ;;  %v4298_v34 = vpop.f32.mrb[34].mxu0  ;;  %4435 = vmatprep.mubr.bf16.mxu0 %v5825_v27 }
 0x2cc   :  { %v1358_v35 = vadd.f32 %v4298_v34, %v5821_v25  ;;  %v1289_v36 = vpop.f32.mrb[35].mxu0  ;;  %4436 = vmatmul.mubr.bf16.gmra.mrb[60].mxu0 %v5823_v26  ;;  %v1373_v39 = vmax.f32 %v1357_v30, 0.0 }
 0x2cd   :  { %v1356_v38 = vadd.f32 %v5821_v25, %v1289_v36  ;;  %4452 = vmatpush3.bf16.msra.mxu0 %v5072_v22  ;;  %v1371_v45 = vmax.f32 %v1355_v33, 0.0 }
 0x2ce   :  { %v1374_v44 = vmax.f32 %v1358_v35, 0.0  ;;  %4453 = vmatprep.subr.bf16.mxu0 %v5074_v4 }
 0x2cf   :  { %v1372_v50 = vmax.f32 %v1356_v38, 0.0 }
 0x2d0   :  { %v1388_v51 = vpack.c.bf16 %v1374_v44, %v1373_v39 }
 0x2d1   :  { %v1387_v54 = vpack.c.bf16 %v1372_v50, %v1371_v45  ;;  %v4301_v56 = vpop.f32.mrb[36].mxu0  ;;  %4454 = vmatpush3.bf16.msra.mxu0 %v5074_v4  ;;  %v5079_v4 = vld [vmem:[#allocation11 + $0x60] sm:$0xff]   ;;  %v5080_v45 = vld [vmem:[#allocation11 + $0x68] sm:$0xff]  }
 0x2d2   :  { %v1361_v57 = vadd.f32 %v4301_v56, %v5821_v25  ;;  %v1302_v58 = vpop.f32.mrb[37].mxu0 }
 0x2d3   :  { %v1359_v60 = vadd.f32 %v5821_v25, %v1302_v58  ;;  %v4302_v61 = vpop.f32.mrb[38].mxu0  ;;  %4327 = vmatprep.mubr.bf16.mxu1 %v1387_v54  ;;  %4455 = vmatprep.mubr.bf16.mxu0 %v1387_v54 }
 0x2d4   :  { %v1362_v62 = vadd.f32 %v4302_v61, %v5821_v25  ;;  %v1305_v63 = vpop.f32.mrb[39].mxu0  ;;  %4328 = vmatmul.mubr.bf16.vlgmr.msra.gmra.mrb[16].mxu1 %v1388_v51  ;;  %4456 = vmatmul.mubr.bf16.vlgmr.msra.gmra.mrb[64].mxu0 %v1388_v51  ;;  %v1377_v5 = vmax.f32 %v1361_v57, 0.0 }
 0x2d5   :  { %v1360_v0 = vadd.f32 %v5821_v25, %v1305_v63  ;;  %4344 = vmatpush3.bf16.msra.mxu1 %v5776_v3  ;;  %v1375_v8 = vmax.f32 %v1359_v60, 0.0  ;;  %v5081_v60 = vld [vmem:[#allocation11 + $0x70] sm:$0xff]  }
 0x2d6   :  { %v1378_v6 = vmax.f32 %v1362_v62, 0.0  ;;  %4345 = vmatprep.subr.bf16.mxu1 %v5076_v59 }
 0x2d7   :  { %v1376_v9 = vmax.f32 %v1360_v0, 0.0 }
 0x2d8   :  { %v1390_v10 = vpack.c.bf16 %v1378_v6, %v1377_v5  ;;  %v5082_v5 = vld [vmem:[#allocation11 + $0x78] sm:$0xff]  }
 0x2d9   :  { %v1389_v11 = vpack.c.bf16 %v1376_v9, %v1375_v8  ;;  %v4305_v12 = vpop.f32.mrb[40].mxu0  ;;  %4346 = vmatpush3.bf16.msra.mxu1 %v5076_v59 }
 0x2da   :  { %v1365_v14 = vadd.f32 %v4305_v12, %v5821_v25  ;;  %v1318_v15 = vpop.f32.mrb[41].mxu0  ;;  %4347 = vmatprep.subr.bf16.mxu1 %v5077_v7 }
 0x2db   :  { %v1363_v18 = vadd.f32 %v5821_v25, %v1318_v15  ;;  %v4306_v22 = vpop.f32.mrb[42].mxu0  ;;  %4331 = vmatprep.mubr.bf16.mxu1 %v1389_v11  ;;  %4459 = vmatprep.mubr.bf16.mxu0 %v1389_v11 }
 0x2dc   :  { %v1366_v3 = vadd.f32 %v4306_v22, %v5821_v25  ;;  %v1321_v23 = vpop.f32.mrb[43].mxu0  ;;  %4332 = vmatmul.mubr.bf16.gmra.mrb[20].mxu1 %v1390_v10  ;;  %4460 = vmatmul.mubr.bf16.gmra.mrb[68].mxu0 %v1390_v10  ;;  %v1381_v30 = vmax.f32 %v1365_v14, 0.0 }
 0x2dd   :  { %v1364_v28 = vadd.f32 %v5821_v25, %v1321_v23  ;;  %4348 = vmatpush3.bf16.msra.mxu1 %v5077_v7  ;;  %v1379_v33 = vmax.f32 %v1363_v18, 0.0 }
 0x2de   :  { %v1382_v31 = vmax.f32 %v1366_v3, 0.0  ;;  %4349 = vmatprep.subr.bf16.mxu1 %v5078_v17 }
 0x2df   :  { %v1380_v34 = vmax.f32 %v1364_v28, 0.0 }
 0x2e0   :  { %v1392_v35 = vpack.c.bf16 %v1382_v31, %v1381_v30 }
 0x2e1   :  { %v1391_v36 = vpack.c.bf16 %v1380_v34, %v1379_v33  ;;  %v4309_v38 = vpop.f32.mrb[44].mxu0  ;;  %4350 = vmatpush3.bf16.msra.mxu1 %v5078_v17 }
 0x2e2   :  { %v1369_v39 = vadd.f32 %v4309_v38, %v5821_v25  ;;  %v1334_v44 = vpop.f32.mrb[45].mxu0  ;;  %4351 = vmatprep.subr.bf16.mxu1 %v5079_v4 }
 0x2e3   :  { %v1367_v50 = vadd.f32 %v5821_v25, %v1334_v44  ;;  %v4310_v51 = vpop.f32.mrb[46].mxu0  ;;  %4335 = vmatprep.mubr.bf16.mxu1 %v1391_v36  ;;  %4463 = vmatprep.mubr.bf16.mxu0 %v1391_v36 }
 0x2e4   :  { %v1370_v54 = vadd.f32 %v4310_v51, %v5821_v25  ;;  %v1337_v56 = vpop.f32.mrb[47].mxu0  ;;  %4336 = vmatmul.mubr.bf16.gmra.mrb[24].mxu1 %v1392_v35  ;;  %4464 = vmatmul.mubr.bf16.gmra.mrb[72].mxu0 %v1392_v35  ;;  %v1385_v58 = vmax.f32 %v1369_v39, 0.0 }
 0x2e5   :  { %v1368_v57 = vadd.f32 %v5821_v25, %v1337_v56  ;;  %4352 = vmatpush3.bf16.msra.mxu1 %v5079_v4  ;;  %v1383_v61 = vmax.f32 %v1367_v50, 0.0 }
 0x2e6   :  { %v1386_v59 = vmax.f32 %v1370_v54, 0.0  ;;  %4353 = vmatprep.subr.bf16.mxu1 %v5080_v45 }
 0x2e7   :  { %v1384_v62 = vmax.f32 %v1368_v57, 0.0 }
 0x2e8   :  { %v1394_v63 = vpack.c.bf16 %v1386_v59, %v1385_v58 }
 0x2e9   :  { %v1393_v0 = vpack.c.bf16 %v1384_v62, %v1383_v61  ;;  %4354 = vmatpush3.bf16.msra.mxu1 %v5080_v45  ;;  %v5086_v61 = vld [vmem:[#allocation10 + $0x98] sm:$0xff]   ;;  %v5088_v62 = vld [vmem:[#allocation10 + $0xa8] sm:$0xff]  }
 0x2ea   :  { %4355 = vmatprep.subr.bf16.mxu1 %v5081_v60 }
 0x2eb   :  { %4339 = vmatprep.mubr.bf16.mxu1 %v1393_v0  ;;  %4467 = vmatprep.mubr.bf16.mxu0 %v1393_v0  ;;  %v5102_v0 = vld [vmem:[#allocation13 + $0xa8] sm:$0xff]  }
 0x2ec   :  { %4340 = vmatmul.mubr.bf16.gmra.mrb[28].mxu1 %v1394_v63  ;;  %4468 = vmatmul.mubr.bf16.gmra.mrb[76].mxu0 %v1394_v63  ;;  %v5094_v63 = vld [vmem:[#allocation13 + $0x88] sm:$0xff]  }
 0x2ed   :  { %4356 = vmatpush3.bf16.msra.mxu1 %v5081_v60  ;;  %4359 = vmatprep.mubr.bf16.mxu1 %v5790_v20  ;;  %v5083_v60 = vld [vmem:[#allocation10 + $0x80] sm:$0xff]  }
 0x2ee   :  { %4357 = vmatprep.subr.bf16.mxu1 %v5082_v5  ;;  %4487 = vmatprep.mubr.bf16.mxu0 %v5731_v49 }
 0x2f1   :  { %4358 = vmatpush3.bf16.msra.mxu1 %v5082_v5  ;;  %v5104_v5 = vld [vmem:[#allocation13 + $0xb0] sm:$0xff]  }
 0x2f4   :  { %4360 = vmatmul.mubr.bf16.vlgmr.msra.gmra.mrb[32].mxu1 %v5788_v19 }
 0x2f5   :  { %4363 = vmatprep.mubr.bf16.mxu1 %v5800_v41 }
 0x2fc   :  { %4364 = vmatmul.mubr.bf16.gmra.mrb[36].mxu1 %v5798_v40 }
 0x2fd   :  { %4367 = vmatprep.mubr.bf16.mxu1 %v5810_v2 }
 0x304   :  { %4368 = vmatmul.mubr.bf16.gmra.mrb[40].mxu1 %v5808_v1 }
 0x305   :  { %4371 = vmatprep.mubr.bf16.mxu1 %v5825_v27 }
 0x30c   :  { %4372 = vmatmul.mubr.bf16.gmra.mrb[44].mxu1 %v5823_v26 }
 0x30d   :  { %4391 = vmatprep.mubr.bf16.mxu1 %v5721_v48 }
 0x387   :  { %v4425_v20 = vpop.f32.mrb[48].mxu0 }
 0x388   :  { %v1990_v25 = vpop.f32.mrb[49].mxu0 }
 0x389   :  { %v4426_v49 = vpop.f32.mrb[50].mxu0 }
 0x38a   :  { %v2054_v6 = vpack.c.bf16 %v4426_v49, %v4425_v20  ;;  %v1993_v7 = vpop.f32.mrb[51].mxu0  ;;  %v5106_v20 = vld [vmem:[#allocation13 + $0xb8] sm:$0xff]   ;;  %v5876_v49 = vld [vmem:[%s6043_s9 + $0x1] ss:$0 sm:$0xff] }
 0x38b   :  { %v2053_v19 = vpack.c.bf16 %v1993_v7, %v1990_v25  ;;  %v5870_v25 = vld [vmem:[#allocation14 + $0x80] sm:$0xff]  }
 0x38d   :  { %4471 = vmatprep.subr.bf16.mxu0 %v2053_v19 }
 0x38e   :  { %4472 = vmatpush3.bf16.msra.mxu0 %v2053_v19 }
 0x38f   :  { %v4429_v41 = vpop.f32.mrb[52].mxu0  ;;  %4473 = vmatprep.subr.bf16.mxu0 %v2054_v6 }
 0x390   :  { %v2006_v40 = vpop.f32.mrb[53].mxu0 }
 0x391   :  { %v4430_v2 = vpop.f32.mrb[54].mxu0 }
 0x392   :  { %v2056_v8 = vpack.c.bf16 %v4430_v2, %v4429_v41  ;;  %v2009_v1 = vpop.f32.mrb[55].mxu0  ;;  %4474 = vmatpush3.bf16.msra.mxu0 %v2054_v6 }
 0x393   :  { %v2055_v27 = vpack.c.bf16 %v2009_v1, %v2006_v40 }
 0x395   :  { %4475 = vmatprep.subr.bf16.mxu0 %v2055_v27 }
 0x396   :  { %4476 = vmatpush3.bf16.msra.mxu0 %v2055_v27 }
 0x397   :  { %v4433_v26 = vpop.f32.mrb[56].mxu0  ;;  %4477 = vmatprep.subr.bf16.mxu0 %v2056_v8 }
 0x398   :  { %v2022_v48 = vpop.f32.mrb[57].mxu0 }
 0x399   :  { %v4434_v9 = vpop.f32.mrb[58].mxu0 }
 0x39a   :  { %v2058_v10 = vpack.c.bf16 %v4434_v9, %v4433_v26  ;;  %v2025_v11 = vpop.f32.mrb[59].mxu0  ;;  %4478 = vmatpush3.bf16.msra.mxu0 %v2056_v8 }
 0x39b   :  { %v2057_v12 = vpack.c.bf16 %v2025_v11, %v2022_v48 }
 0x39d   :  { %4479 = vmatprep.subr.bf16.mxu0 %v2057_v12 }
 0x39e   :  { %4480 = vmatpush3.bf16.msra.mxu0 %v2057_v12 }
 0x39f   :  { %v4437_v14 = vpop.f32.mrb[60].mxu0  ;;  %4481 = vmatprep.subr.bf16.mxu0 %v2058_v10 }
 0x3a0   :  { %v2038_v15 = vpop.f32.mrb[61].mxu0 }
 0x3a1   :  { %v4438_v17 = vpop.f32.mrb[62].mxu0 }
 0x3a2   :  { %v2060_v18 = vpack.c.bf16 %v4438_v17, %v4437_v14  ;;  %v2041_v22 = vpop.f32.mrb[63].mxu0  ;;  %4482 = vmatpush3.bf16.msra.mxu0 %v2058_v10  ;;  %v5093_v17 = vld [vmem:[#allocation11 + $0x88] sm:$0xff]  }
 0x3a3   :  { %v2059_v3 = vpack.c.bf16 %v2041_v22, %v2038_v15 }
 0x3a5   :  { %4483 = vmatprep.subr.bf16.mxu0 %v2059_v3 }
 0x3a6   :  { %4484 = vmatpush3.bf16.msra.mxu0 %v2059_v3 }
 0x3a7   :  { %v4329_v23 = vpop.f32.mrb[16].mxu1  ;;  %4485 = vmatprep.subr.bf16.mxu0 %v2060_v18 }
 0x3a8   :  { %v1513_v28 = vpop.f32.mrb[17].mxu1 }
 0x3a9   :  { %v4330_v30 = vpop.f32.mrb[18].mxu1 }
 0x3aa   :  { %v1577_v31 = vpack.c.bf16 %v4330_v30, %v4329_v23  ;;  %v1516_v4 = vpop.f32.mrb[19].mxu1  ;;  %4486 = vmatpush3.bf16.msra.mxu0 %v2060_v18 }
 0x3ab   :  { %v1576_v33 = vpack.c.bf16 %v1516_v4, %v1513_v28  ;;  %v5095_v4 = vld [vmem:[#allocation11 + $0x90] sm:$0xff]  }
 0x3ad   :  { %4375 = vmatprep.subr.bf16.mxu1 %v1576_v33  ;;  %4488 = vmatmul.mubr.bf16.vlgmr.msra.gmra.mrb[64].mxu0 %v5755_v42 }
 0x3ae   :  { %4376 = vmatpush3.bf16.msra.mxu1 %v1576_v33  ;;  %4491 = vmatprep.mubr.bf16.mxu0 %v5757_v43 }
 0x3af   :  { %v4333_v34 = vpop.f32.mrb[20].mxu1  ;;  %4377 = vmatprep.subr.bf16.mxu1 %v1577_v31 }
 0x3b0   :  { %v1529_v35 = vpop.f32.mrb[21].mxu1 }
 0x3b1   :  { %v4334_v36 = vpop.f32.mrb[22].mxu1 }
 0x3b2   :  { %v1579_v38 = vpack.c.bf16 %v4334_v36, %v4333_v34  ;;  %v1532_v39 = vpop.f32.mrb[23].mxu1  ;;  %4378 = vmatpush3.bf16.msra.mxu1 %v1577_v31 }
 0x3b3   :  { %v1578_v44 = vpack.c.bf16 %v1532_v39, %v1529_v35 }
 0x3b5   :  { %4379 = vmatprep.subr.bf16.mxu1 %v1578_v44  ;;  %4492 = vmatmul.mubr.bf16.gmra.mrb[68].mxu0 %v5761_v46 }
 0x3b6   :  { %4380 = vmatpush3.bf16.msra.mxu1 %v1578_v44  ;;  %4495 = vmatprep.mubr.bf16.mxu0 %v5763_v47 }
 0x3b7   :  { %v4337_v45 = vpop.f32.mrb[24].mxu1  ;;  %4381 = vmatprep.subr.bf16.mxu1 %v1579_v38 }
 0x3b8   :  { %v1545_v42 = vpop.f32.mrb[25].mxu1 }
 0x3b9   :  { %v4338_v50 = vpop.f32.mrb[26].mxu1 }
 0x3ba   :  { %v1581_v51 = vpack.c.bf16 %v4338_v50, %v4337_v45  ;;  %v1548_v43 = vpop.f32.mrb[27].mxu1  ;;  %4382 = vmatpush3.bf16.msra.mxu1 %v1579_v38  ;;  %v5097_v45 = vld [vmem:[#allocation11 + $0x98] sm:$0xff]  }
 0x3bb   :  { %v1580_v54 = vpack.c.bf16 %v1548_v43, %v1545_v42 }
 0x3bd   :  { %4383 = vmatprep.subr.bf16.mxu1 %v1580_v54  ;;  %4496 = vmatmul.mubr.bf16.gmra.mrb[72].mxu0 %v5767_v52  ;;  %v5084_v52 = vld [vmem:[#allocation10 + $0x88] sm:$0xff]  }
 0x3be   :  { %4384 = vmatpush3.bf16.msra.mxu1 %v1580_v54  ;;  %4499 = vmatprep.mubr.bf16.mxu0 %v5769_v53  ;;  %v5085_v53 = vld [vmem:[#allocation10 + $0x90] sm:$0xff]  }
 0x3bf   :  { %v4341_v56 = vpop.f32.mrb[28].mxu1  ;;  %4385 = vmatprep.subr.bf16.mxu1 %v1581_v51 }
 0x3c0   :  { %v1561_v46 = vpop.f32.mrb[29].mxu1 }
 0x3c1   :  { %v4342_v57 = vpop.f32.mrb[30].mxu1 }
 0x3c2   :  { %v1583_v58 = vpack.c.bf16 %v4342_v57, %v4341_v56  ;;  %v1564_v47 = vpop.f32.mrb[31].mxu1  ;;  %4386 = vmatpush3.bf16.msra.mxu1 %v1581_v51  ;;  %v5099_v57 = vld [vmem:[#allocation11 + $0xa0] sm:$0xff]  }
 0x3c3   :  { %v1582_v59 = vpack.c.bf16 %v1564_v47, %v1561_v46 }
 0x3c5   :  { %4387 = vmatprep.subr.bf16.mxu1 %v1582_v59  ;;  %4500 = vmatmul.mubr.bf16.gmra.mrb[76].mxu0 %v5773_v55  ;;  %v5087_v55 = vld [vmem:[#allocation10 + $0xa0] sm:$0xff]  }
 0x3c6   :  { %4388 = vmatpush3.bf16.msra.mxu1 %v1582_v59 }
 0x3c7   :  { %4389 = vmatprep.subr.bf16.mxu1 %v1583_v58 }
 0x3ca   :  { %4390 = vmatpush3.bf16.msra.mxu1 %v1583_v58 }
 0x3cb   :  { %4503 = vmatprep.subr.bf16.mxu1 %v5083_v60 }
 0x3cd   :  { %4392 = vmatmul.mubr.bf16.vlgmr.msra.gmra.mrb[32].mxu1 %v5734_v13  ;;  %v5089_v13 = vld [vmem:[#allocation10 + $0xb0] sm:$0xff]  }
 0x3ce   :  { %4395 = vmatprep.mubr.bf16.mxu1 %v5736_v16  ;;  %4504 = vmatpush3.bf16.msra.mxu1 %v5083_v60  ;;  %v5090_v16 = vld [vmem:[#allocation10 + $0xb8] sm:$0xff]  }
 0x3cf   :  { %4505 = vmatprep.subr.bf16.mxu1 %v5084_v52 }
 0x3d2   :  { %4506 = vmatpush3.bf16.msra.mxu1 %v5084_v52 }
 0x3d3   :  { %4507 = vmatprep.subr.bf16.mxu1 %v5085_v53 }
 0x3d5   :  { %4396 = vmatmul.mubr.bf16.gmra.mrb[36].mxu1 %v5740_v21  ;;  %v5091_v21 = vld [vmem:[#allocation11 + $0x80] sm:$0xff]  }
 0x3d6   :  { %4399 = vmatprep.mubr.bf16.mxu1 %v5742_v24  ;;  %4508 = vmatpush3.bf16.msra.mxu1 %v5085_v53  ;;  %v5092_v24 = vld [vmem:[#allocation13 + $0x80] sm:$0xff]  }
 0x3d7   :  { %4509 = vmatprep.subr.bf16.mxu1 %v5086_v61  ;;  %4599 = vmatprep.subr.bf16.mxu0 %v5092_v24 }
 0x3d8   :  { %4600 = vmatpush3.bf16.msra.mxu0 %v5092_v24 }
 0x3d9   :  { %4601 = vmatprep.subr.bf16.mxu0 %v5094_v63 }
 0x3da   :  { %4510 = vmatpush3.bf16.msra.mxu1 %v5086_v61 }
 0x3db   :  { %4511 = vmatprep.subr.bf16.mxu1 %v5087_v55 }
 0x3dc   :  { %4602 = vmatpush3.bf16.msra.mxu0 %v5094_v63 }
 0x3dd   :  { %4400 = vmatmul.mubr.bf16.gmra.mrb[40].mxu1 %v5746_v29  ;;  %v5096_v29 = vld [vmem:[#allocation13 + $0x90] sm:$0xff]  }
 0x3de   :  { %4403 = vmatprep.mubr.bf16.mxu1 %v5748_v32  ;;  %4512 = vmatpush3.bf16.msra.mxu1 %v5087_v55  ;;  %v5098_v32 = vld [vmem:[#allocation13 + $0x98] sm:$0xff]   ;;  %v5101_v55 = vld [vmem:[#allocation11 + $0xa8] sm:$0xff]  }
 0x3df   :  { %4513 = vmatprep.subr.bf16.mxu1 %v5088_v62  ;;  %4603 = vmatprep.subr.bf16.mxu0 %v5096_v29 }
 0x3e0   :  { %4604 = vmatpush3.bf16.msra.mxu0 %v5096_v29 }
 0x3e1   :  { %4605 = vmatprep.subr.bf16.mxu0 %v5098_v32 }
 0x3e2   :  { %4514 = vmatpush3.bf16.msra.mxu1 %v5088_v62 }
 0x3e3   :  { %4515 = vmatprep.subr.bf16.mxu1 %v5089_v13 }
 0x3e4   :  { %4606 = vmatpush3.bf16.msra.mxu0 %v5098_v32  ;;  %v5103_v32 = vld [vmem:[#allocation11 + $0xb0] sm:$0xff]  }
 0x3e5   :  { %4404 = vmatmul.mubr.bf16.gmra.mrb[44].mxu1 %v5752_v37  ;;  %v5100_v37 = vld [vmem:[#allocation13 + $0xa0] sm:$0xff]  }
 0x3e6   :  { %4516 = vmatpush3.bf16.msra.mxu1 %v5089_v13  ;;  %4607 = vmatprep.subr.bf16.mxu0 %v5100_v37 }
 0x3e7   :  { %4517 = vmatprep.subr.bf16.mxu1 %v5090_v16 }
 0x3e8   :  { %4608 = vmatpush3.bf16.msra.mxu0 %v5100_v37 }
 0x3e9   :  { %4609 = vmatprep.subr.bf16.mxu0 %v5102_v0 }
 0x3ea   :  { %4518 = vmatpush3.bf16.msra.mxu1 %v5090_v16 }
 0x3eb   :  { %4535 = vmatprep.subr.bf16.mxu1 %v5091_v21 }
 0x3ec   :  { %4610 = vmatpush3.bf16.msra.mxu0 %v5102_v0 }
 0x3ed   :  { %4611 = vmatprep.subr.bf16.mxu0 %v5104_v5 }
 0x3f0   :  { %4612 = vmatpush3.bf16.msra.mxu0 %v5104_v5  ;;  %v5915_v5 = vld [vmem:[%s6040_s6 + $0x1] ss:$0 sm:$0xff] }
 0x3f1   :  { %4613 = vmatprep.subr.bf16.mxu0 %v5106_v20 }
 0x3f4   :  { %4614 = vmatpush3.bf16.msra.mxu0 %v5106_v20 }
 0x3f5   :  { %4631 = vmatprep.subr.bf16.mxu0 %v5870_v25 }
 0x480   :  { %v4489_v6 = vpop.f32.mrb[64].mxu0 }
 0x481   :  { %v2311_v7 = vadd.f32 %v4489_v6, %v5876_v49  ;;  %v2240_v19 = vpop.f32.mrb[65].mxu0 }
 0x482   :  { %v2309_v41 = vadd.f32 %v5876_v49, %v2240_v19  ;;  %v4490_v40 = vpop.f32.mrb[66].mxu0 }
 0x483   :  { %v2312_v2 = vadd.f32 %v4490_v40, %v5876_v49  ;;  %v2243_v8 = vpop.f32.mrb[67].mxu0  ;;  %v2327_v27 = vmax.f32 %v2311_v7, 0.0 }
 0x484   :  { %v2310_v1 = vadd.f32 %v5876_v49, %v2243_v8  ;;  %v2325_v48 = vmax.f32 %v2309_v41, 0.0  ;;  %v5105_v41 = vld [vmem:[#allocation11 + $0xb8] sm:$0xff]  }
 0x485   :  { %v2328_v26 = vmax.f32 %v2312_v2, 0.0 }
 0x486   :  { %v2326_v9 = vmax.f32 %v2310_v1, 0.0 }
 0x487   :  { %v5882_v10 = vpack.c.bf16 %v2328_v26, %v2327_v27 }
 0x488   :  { %v5884_v11 = vpack.c.bf16 %v2326_v9, %v2325_v48  ;;  %v4493_v12 = vpop.f32.mrb[68].mxu0 }
 0x489   :  { %v2315_v14 = vadd.f32 %v4493_v12, %v5876_v49  ;;  %v2256_v15 = vpop.f32.mrb[69].mxu0 }
 0x48a   :  { %v2313_v18 = vadd.f32 %v5876_v49, %v2256_v15  ;;  %v4494_v22 = vpop.f32.mrb[70].mxu0  ;;  %4519 = vmatprep.mubr.bf16.mxu1 %v5884_v11 }
 0x48b   :  { %v2316_v3 = vadd.f32 %v4494_v22, %v5876_v49  ;;  %v2259_v23 = vpop.f32.mrb[71].mxu0  ;;  %4520 = vmatmul.mubr.bf16.vlgmr.msra.gmra.mrb[48].mxu1 %v5882_v10  ;;  %v2331_v30 = vmax.f32 %v2315_v14, 0.0 }
 0x48c   :  { %v2314_v28 = vadd.f32 %v5876_v49, %v2259_v23  ;;  %4536 = vmatpush3.bf16.msra.mxu1 %v5091_v21  ;;  %v2329_v33 = vmax.f32 %v2313_v18, 0.0 }
 0x48d   :  { %v2332_v31 = vmax.f32 %v2316_v3, 0.0  ;;  %4537 = vmatprep.subr.bf16.mxu1 %v5093_v17  ;;  %v5108_v3 = vld [vmem:[#allocation14 + $0x88] sm:$0xff]  }
 0x48e   :  { %v2330_v34 = vmax.f32 %v2314_v28, 0.0 }
 0x48f   :  { %v5892_v35 = vpack.c.bf16 %v2332_v31, %v2331_v30 }
 0x490   :  { %v5894_v36 = vpack.c.bf16 %v2330_v34, %v2329_v33  ;;  %v4497_v38 = vpop.f32.mrb[72].mxu0  ;;  %4538 = vmatpush3.bf16.msra.mxu1 %v5093_v17 }
 0x491   :  { %v2319_v39 = vadd.f32 %v4497_v38, %v5876_v49  ;;  %v2272_v44 = vpop.f32.mrb[73].mxu0  ;;  %4539 = vmatprep.subr.bf16.mxu1 %v5095_v4  ;;  %v5109_v38 = vld [vmem:[#allocation14 + $0x90] sm:$0xff]  }
 0x492   :  { %v2317_v42 = vadd.f32 %v5876_v49, %v2272_v44  ;;  %v4498_v50 = vpop.f32.mrb[74].mxu0  ;;  %4523 = vmatprep.mubr.bf16.mxu1 %v5894_v36 }
 0x493   :  { %v2320_v51 = vadd.f32 %v4498_v50, %v5876_v49  ;;  %v2275_v43 = vpop.f32.mrb[75].mxu0  ;;  %4524 = vmatmul.mubr.bf16.gmra.mrb[52].mxu1 %v5892_v35  ;;  %v2335_v56 = vmax.f32 %v2319_v39, 0.0 }
 0x494   :  { %v2318_v54 = vadd.f32 %v5876_v49, %v2275_v43  ;;  %4540 = vmatpush3.bf16.msra.mxu1 %v5095_v4  ;;  %v2333_v58 = vmax.f32 %v2317_v42, 0.0 }
 0x495   :  { %v2336_v46 = vmax.f32 %v2320_v51, 0.0  ;;  %4541 = vmatprep.subr.bf16.mxu1 %v5097_v45 }
 0x496   :  { %v2334_v47 = vmax.f32 %v2318_v54, 0.0  ;;  %v5110_v54 = vld [vmem:[#allocation14 + $0x98] sm:$0xff]  }
 0x497   :  { %v5902_v59 = vpack.c.bf16 %v2336_v46, %v2335_v56 }
 0x498   :  { %v5904_v60 = vpack.c.bf16 %v2334_v47, %v2333_v58  ;;  %v4501_v52 = vpop.f32.mrb[76].mxu0  ;;  %4542 = vmatpush3.bf16.msra.mxu1 %v5097_v45 }
 0x499   :  { %v2323_v53 = vadd.f32 %v4501_v52, %v5876_v49  ;;  %v2288_v61 = vpop.f32.mrb[77].mxu0  ;;  %4543 = vmatprep.subr.bf16.mxu1 %v5099_v57 }
 0x49a   :  { %v2321_v62 = vadd.f32 %v5876_v49, %v2288_v61  ;;  %v4502_v13 = vpop.f32.mrb[78].mxu0  ;;  %4527 = vmatprep.mubr.bf16.mxu1 %v5904_v60 }
 0x49b   :  { %v2324_v16 = vadd.f32 %v4502_v13, %v5876_v49  ;;  %v2291_v21 = vpop.f32.mrb[79].mxu0  ;;  %4528 = vmatmul.mubr.bf16.gmra.mrb[56].mxu1 %v5902_v59  ;;  %v2339_v63 = vmax.f32 %v2323_v53, 0.0  ;;  %v5111_v53 = vld [vmem:[#allocation14 + $0xa0] sm:$0xff]  }
 0x49c   :  { %v2322_v24 = vadd.f32 %v5876_v49, %v2291_v21  ;;  %4544 = vmatpush3.bf16.msra.mxu1 %v5099_v57  ;;  %v2337_v37 = vmax.f32 %v2321_v62, 0.0 }
 0x49d   :  { %v2340_v29 = vmax.f32 %v2324_v16, 0.0  ;;  %4545 = vmatprep.subr.bf16.mxu1 %v5101_v55 }
 0x49e   :  { %v2338_v0 = vmax.f32 %v2322_v24, 0.0 }
 0x49f   :  { %v5917_v20 = vpack.c.bf16 %v2340_v29, %v2339_v63  ;;  %v5112_v63 = vld [vmem:[#allocation14 + $0xa8] sm:$0xff]  }
 0x4a0   :  { %v5919_v6 = vpack.c.bf16 %v2338_v0, %v2337_v37  ;;  %v4393_v7 = vpop.f32.mrb[32].mxu1  ;;  %4546 = vmatpush3.bf16.msra.mxu1 %v5101_v55 }
 0x4a1   :  { %v1834_v49 = vadd.f32 %v4393_v7, %v5915_v5  ;;  %v1763_v19 = vpop.f32.mrb[33].mxu1  ;;  %4547 = vmatprep.subr.bf16.mxu1 %v5103_v32 }
 0x4a2   :  { %v1832_v40 = vadd.f32 %v5915_v5, %v1763_v19  ;;  %v4394_v2 = vpop.f32.mrb[34].mxu1  ;;  %4531 = vmatprep.mubr.bf16.mxu1 %v5919_v6 }
 0x4a3   :  { %v1835_v8 = vadd.f32 %v4394_v2, %v5915_v5  ;;  %v1766_v1 = vpop.f32.mrb[35].mxu1  ;;  %4532 = vmatmul.mubr.bf16.gmra.mrb[60].mxu1 %v5917_v20  ;;  %v1850_v26 = vmax.f32 %v1834_v49, 0.0 }
 0x4a4   :  { %v1833_v27 = vadd.f32 %v5915_v5, %v1766_v1  ;;  %4548 = vmatpush3.bf16.msra.mxu1 %v5103_v32  ;;  %v1848_v9 = vmax.f32 %v1832_v40, 0.0 }
 0x4a5   :  { %v1851_v48 = vmax.f32 %v1835_v8, 0.0  ;;  %4549 = vmatprep.subr.bf16.mxu1 %v5105_v41 }
 0x4a6   :  { %v1849_v12 = vmax.f32 %v1833_v27, 0.0  ;;  %v5114_v27 = vld [vmem:[#allocation14 + $0xb8] sm:$0xff]  }
 0x4a7   :  { %v1865_v14 = vpack.c.bf16 %v1851_v48, %v1850_v26  ;;  %v5118_v26 = vld [vmem:[#allocation5] sm:$0xff]  }
 0x4a8   :  { %v1864_v15 = vpack.c.bf16 %v1849_v12, %v1848_v9  ;;  %v4397_v17 = vpop.f32.mrb[36].mxu1  ;;  %4550 = vmatpush3.bf16.msra.mxu1 %v5105_v41  ;;  %v5113_v41 = vld [vmem:[#allocation14 + $0xb0] sm:$0xff]  }
 0x4a9   :  { %v1838_v18 = vadd.f32 %v4397_v17, %v5915_v5  ;;  %v1779_v22 = vpop.f32.mrb[37].mxu1 }
 0x4aa   :  { %v1836_v23 = vadd.f32 %v5915_v5, %v1779_v22  ;;  %v4398_v28 = vpop.f32.mrb[38].mxu1  ;;  %4551 = vmatprep.mubr.bf16.mxu1 %v1864_v15  ;;  %4615 = vmatprep.mubr.bf16.mxu0 %v1864_v15 }
 0x4ab   :  { %v1839_v30 = vadd.f32 %v4398_v28, %v5915_v5  ;;  %v1782_v31 = vpop.f32.mrb[39].mxu1  ;;  %4552 = vmatmul.mubr.bf16.vlgmr.msra.gmra.mrb[64].mxu1 %v1865_v14  ;;  %4616 = vmatmul.mubr.bf16.vlgmr.msra.gmra.mrb[80].mxu0 %v1865_v14  ;;  %v1854_v33 = vmax.f32 %v1838_v18, 0.0 }
 0x4ac   :  { %v1837_v4 = vadd.f32 %v5915_v5, %v1782_v31  ;;  %4632 = vmatpush3.bf16.msra.mxu0 %v5870_v25  ;;  %v1852_v39 = vmax.f32 %v1836_v23, 0.0 }
 0x4ad   :  { %v1855_v34 = vmax.f32 %v1839_v30, 0.0  ;;  %4633 = vmatprep.subr.bf16.mxu0 %v5108_v3 }
 0x4ae   :  { %v1853_v44 = vmax.f32 %v1837_v4, 0.0 }
 0x4af   :  { %v1867_v45 = vpack.c.bf16 %v1855_v34, %v1854_v33 }
 0x4b0   :  { %v1866_v42 = vpack.c.bf16 %v1853_v44, %v1852_v39  ;;  %v4401_v50 = vpop.f32.mrb[40].mxu1  ;;  %4634 = vmatpush3.bf16.msra.mxu0 %v5108_v3 }
 0x4b1   :  { %v1842_v51 = vadd.f32 %v4401_v50, %v5915_v5  ;;  %v1795_v43 = vpop.f32.mrb[41].mxu1  ;;  %4635 = vmatprep.subr.bf16.mxu0 %v5109_v38 }
 0x4b2   :  { %v1840_v56 = vadd.f32 %v5915_v5, %v1795_v43  ;;  %v4402_v46 = vpop.f32.mrb[42].mxu1  ;;  %4555 = vmatprep.mubr.bf16.mxu1 %v1866_v42  ;;  %4619 = vmatprep.mubr.bf16.mxu0 %v1866_v42  ;;  %v5120_v43 = vld [vmem:[#allocation2 + $0x10] sm:$0xff]  }
 0x4b3   :  { %v1843_v25 = vadd.f32 %v4402_v46, %v5915_v5  ;;  %v1798_v57 = vpop.f32.mrb[43].mxu1  ;;  %4556 = vmatmul.mubr.bf16.gmra.mrb[68].mxu1 %v1867_v45  ;;  %4620 = vmatmul.mubr.bf16.gmra.mrb[84].mxu0 %v1867_v45  ;;  %v1858_v47 = vmax.f32 %v1842_v51, 0.0  ;;  %v5119_v51 = vld [vmem:[#allocation2 + $0x8] sm:$0xff]  }
 0x4b4   :  { %v1841_v58 = vadd.f32 %v5915_v5, %v1798_v57  ;;  %4636 = vmatpush3.bf16.msra.mxu0 %v5109_v38  ;;  %v1856_v61 = vmax.f32 %v1840_v56, 0.0 }
 0x4b5   :  { %v1859_v52 = vmax.f32 %v1843_v25, 0.0  ;;  %4637 = vmatprep.subr.bf16.mxu0 %v5110_v54 }
 0x4b6   :  { %v1857_v55 = vmax.f32 %v1841_v58, 0.0 }
 0x4b7   :  { %v1869_v62 = vpack.c.bf16 %v1859_v52, %v1858_v47  ;;  %v5121_v47 = vld [vmem:[#allocation2 + $0x18] sm:$0xff]   ;;  %v5122_v52 = vld [vmem:[#allocation2 + $0x20] sm:$0xff]  }
 0x4b8   :  { %v1868_v13 = vpack.c.bf16 %v1857_v55, %v1856_v61  ;;  %v4405_v16 = vpop.f32.mrb[44].mxu1  ;;  %4638 = vmatpush3.bf16.msra.mxu0 %v5110_v54 }
 0x4b9   :  { %v1846_v21 = vadd.f32 %v4405_v16, %v5915_v5  ;;  %v1811_v24 = vpop.f32.mrb[45].mxu1  ;;  %4639 = vmatprep.subr.bf16.mxu0 %v5111_v53 }
 0x4ba   :  { %v1844_v29 = vadd.f32 %v5915_v5, %v1811_v24  ;;  %v4406_v32 = vpop.f32.mrb[46].mxu1  ;;  %4559 = vmatprep.mubr.bf16.mxu1 %v1868_v13  ;;  %4623 = vmatprep.mubr.bf16.mxu0 %v1868_v13  ;;  %v5124_v24 = vld [vmem:[#allocation2 + $0x30] sm:$0xff]  }
 0x4bb   :  { %v1847_v37 = vadd.f32 %v4406_v32, %v5915_v5  ;;  %v1814_v0 = vpop.f32.mrb[47].mxu1  ;;  %4560 = vmatmul.mubr.bf16.gmra.mrb[72].mxu1 %v1869_v62  ;;  %4624 = vmatmul.mubr.bf16.gmra.mrb[88].mxu0 %v1869_v62  ;;  %v1862_v49 = vmax.f32 %v1846_v21, 0.0  ;;  %v5123_v21 = vld [vmem:[#allocation2 + $0x28] sm:$0xff]  }
 0x4bc   :  { %v1845_v7 = vadd.f32 %v5915_v5, %v1814_v0  ;;  %4640 = vmatpush3.bf16.msra.mxu0 %v5111_v53  ;;  %v1860_v40 = vmax.f32 %v1844_v29, 0.0  ;;  %v5117_v5 = vld [vmem:[#allocation2] sm:$0xff]  }
 0x4bd   :  { %v1863_v19 = vmax.f32 %v1847_v37, 0.0  ;;  %4641 = vmatprep.subr.bf16.mxu0 %v5112_v63 }
 0x4be   :  { %v1861_v2 = vmax.f32 %v1845_v7, 0.0 }
 0x4bf   :  { %v1871_v8 = vpack.c.bf16 %v1863_v19, %v1862_v49  ;;  %v5125_v49 = vld [vmem:[#allocation2 + $0x38] sm:$0xff]   ;;  %v5126_v19 = vld [vmem:[#allocation5 + $0x8] sm:$0xff]  }
 0x4c0   :  { %v1870_v1 = vpack.c.bf16 %v1861_v2, %v1860_v40  ;;  %4642 = vmatpush3.bf16.msra.mxu0 %v5112_v63  ;;  %v5128_v40 = vld [vmem:[#allocation5 + $0x18] sm:$0xff]   ;;  %v5129_v2 = vld [vmem:[#allocation5 + $0x20] sm:$0xff]  }
 0x4c1   :  { %4643 = vmatprep.subr.bf16.mxu0 %v5113_v41 }
 0x4c2   :  { %4563 = vmatprep.mubr.bf16.mxu1 %v1870_v1  ;;  %4627 = vmatprep.mubr.bf16.mxu0 %v1870_v1  ;;  %v5131_v1 = vld [vmem:[#allocation5 + $0x30] sm:$0xff]  }
 0x4c3   :  { %4564 = vmatmul.mubr.bf16.gmra.mrb[76].mxu1 %v1871_v8  ;;  %4628 = vmatmul.mubr.bf16.gmra.mrb[92].mxu0 %v1871_v8  ;;  %v5130_v8 = vld [vmem:[#allocation5 + $0x28] sm:$0xff]  }
 0x4c4   :  { %4644 = vmatpush3.bf16.msra.mxu0 %v5113_v41  ;;  %4647 = vmatprep.mubr.bf16.mxu0 %v5884_v11  ;;  %v5127_v41 = vld [vmem:[#allocation5 + $0x10] sm:$0xff]  }
 0x4c5   :  { %4645 = vmatprep.subr.bf16.mxu0 %v5114_v27  ;;  %4583 = vmatprep.mubr.bf16.mxu1 %v5117_v5  ;;  %v5427_v5 = vmov 0.0  }
 0x4c8   :  { %4646 = vmatpush3.bf16.msra.mxu0 %v5114_v27  ;;  %v5132_v27 = vld [vmem:[#allocation5 + $0x38] sm:$0xff]  }
 0x4cb   :  { %4648 = vmatmul.mubr.bf16.vlgmr.msra.gmra.mrb[96].mxu0 %v5882_v10 }
 0x4cc   :  { %4651 = vmatprep.mubr.bf16.mxu0 %v5894_v36 }
 0x4d3   :  { %4652 = vmatmul.mubr.bf16.gmra.mrb[100].mxu0 %v5892_v35 }
 0x4d4   :  { %4655 = vmatprep.mubr.bf16.mxu0 %v5904_v60 }
 0x4db   :  { %4656 = vmatmul.mubr.bf16.gmra.mrb[104].mxu0 %v5902_v59 }
 0x4dc   :  { %4659 = vmatprep.mubr.bf16.mxu0 %v5919_v6 }
 0x4e3   :  { %4660 = vmatmul.mubr.bf16.gmra.mrb[108].mxu0 %v5917_v20 }
 0x4e4   :  { %4679 = vmatprep.mubr.bf16.mxu0 %v5118_v26  ;;  %v3405_v26 = vld [vmem:[#allocation16] sm:$0xff] }
 0x55e   :  { %v4521_v11 = vpop.f32.mrb[48].mxu1 }
 0x55f   :  { %v2467_v48 = vpop.f32.mrb[49].mxu1 }
 0x560   :  { %v4522_v9 = vpop.f32.mrb[50].mxu1 }
 0x561   :  { %v2531_v12 = vpack.c.bf16 %v4522_v9, %v4521_v11  ;;  %v2470_v14 = vpop.f32.mrb[51].mxu1  ;;  %v3406_v11 = vld [vmem:[#allocation16 + $0x8] sm:$0xff] }
 0x562   :  { %v2530_v10 = vpack.c.bf16 %v2470_v14, %v2467_v48  ;;  %v3407_v48 = vld [vmem:[#allocation16 + $0x10] sm:$0xff]  ;;  %v4837_v9 = vpack.c.bf16 %v3406_v11, %v3405_v26 }
 0x564   :  { %4567 = vmatprep.subr.bf16.mxu1 %v2530_v10 }
 0x565   :  { %4568 = vmatpush3.bf16.msra.mxu1 %v2530_v10  ;;  %v3409_v10 = vld [vmem:[#allocation16 + $0x20] sm:$0xff] }
 0x566   :  { %v4525_v36 = vpop.f32.mrb[52].mxu1  ;;  %4569 = vmatprep.subr.bf16.mxu1 %v2531_v12 }
 0x567   :  { %v2483_v35 = vpop.f32.mrb[53].mxu1 }
 0x568   :  { %v4526_v60 = vpop.f32.mrb[54].mxu1 }
 0x569   :  { %v2533_v15 = vpack.c.bf16 %v4526_v60, %v4525_v36  ;;  %v2486_v59 = vpop.f32.mrb[55].mxu1  ;;  %4570 = vmatpush3.bf16.msra.mxu1 %v2531_v12  ;;  %v3408_v12 = vld [vmem:[#allocation16 + $0x18] sm:$0xff]  ;;  %v3410_v36 = vld [vmem:[#allocation16 + $0x28] sm:$0xff]  ;;  %v3411_v60 = vld [vmem:[#allocation16 + $0x30] sm:$0xff] }
 0x56a   :  { %v2532_v6 = vpack.c.bf16 %v2486_v59, %v2483_v35  ;;  %v4841_v14 = vpack.c.bf16 %v3408_v12, %v3407_v48  ;;  %v4845_v35 = vpack.c.bf16 %v3410_v36, %v3409_v10 }
 0x56c   :  { %4571 = vmatprep.subr.bf16.mxu1 %v2532_v6 }
 0x56d   :  { %4572 = vmatpush3.bf16.msra.mxu1 %v2532_v6  ;;  %v3413_v6 = vld [vmem:[#allocation16 + $0x40] sm:$0xff] }
 0x56e   :  { %v4529_v20 = vpop.f32.mrb[56].mxu1  ;;  %4573 = vmatprep.subr.bf16.mxu1 %v2533_v15 }
 0x56f   :  { %v2499_v17 = vpop.f32.mrb[57].mxu1 }
 0x570   :  { %v4530_v18 = vpop.f32.mrb[58].mxu1 }
 0x571   :  { %v2535_v22 = vpack.c.bf16 %v4530_v18, %v4529_v20  ;;  %v2502_v3 = vpop.f32.mrb[59].mxu1  ;;  %4574 = vmatpush3.bf16.msra.mxu1 %v2533_v15  ;;  %v3412_v15 = vld [vmem:[#allocation16 + $0x38] sm:$0xff]  ;;  %v3414_v20 = vld [vmem:[#allocation16 + $0x48] sm:$0xff]  ;;  %v3415_v18 = vld [vmem:[#allocation16 + $0x50] sm:$0xff] }
 0x572   :  { %v2534_v23 = vpack.c.bf16 %v2502_v3, %v2499_v17  ;;  %v4849_v59 = vpack.c.bf16 %v3412_v15, %v3411_v60  ;;  %v4853_v17 = vpack.c.bf16 %v3414_v20, %v3413_v6 }
 0x574   :  { %4575 = vmatprep.subr.bf16.mxu1 %v2534_v23 }
 0x575   :  { %4576 = vmatpush3.bf16.msra.mxu1 %v2534_v23  ;;  %v3417_v23 = vld [vmem:[#allocation16 + $0x60] sm:$0xff] }
 0x576   :  { %v4533_v28 = vpop.f32.mrb[60].mxu1  ;;  %4577 = vmatprep.subr.bf16.mxu1 %v2535_v22 }
 0x577   :  { %v2515_v30 = vpop.f32.mrb[61].mxu1 }
 0x578   :  { %v4534_v31 = vpop.f32.mrb[62].mxu1 }
 0x579   :  { %v2537_v4 = vpack.c.bf16 %v4534_v31, %v4533_v28  ;;  %v2518_v33 = vpop.f32.mrb[63].mxu1  ;;  %4578 = vmatpush3.bf16.msra.mxu1 %v2535_v22  ;;  %v3416_v22 = vld [vmem:[#allocation16 + $0x58] sm:$0xff]  ;;  %v3418_v28 = vld [vmem:[#allocation16 + $0x68] sm:$0xff] }
 0x57a   :  { %v2536_v34 = vpack.c.bf16 %v2518_v33, %v2515_v30  ;;  %v4857_v3 = vpack.c.bf16 %v3416_v22, %v3415_v18  ;;  %v3755_v30 = vld [vmem:[%s6040_s6 + $0x2] ss:$0 sm:$0xff]  ;;  %v4861_v31 = vpack.c.bf16 %v3418_v28, %v3417_v23  ;;  %v3420_v33 = vld [vmem:[#allocation16 + $0x78] sm:$0xff] }
 0x57b   :  { %v3773_v22 = vld [vmem:[%s6043_s9 + $0x2] ss:$0 sm:$0xff] }
 0x57c   :  { %4579 = vmatprep.subr.bf16.mxu1 %v2536_v34 }
 0x57d   :  { %4580 = vmatpush3.bf16.msra.mxu1 %v2536_v34 }
 0x57e   :  { %4581 = vmatprep.subr.bf16.mxu1 %v2537_v4  ;;  %v4617_v38 = vpop.f32.mrb[80].mxu0 }
 0x57f   :  { %v2944_v39 = vpop.f32.mrb[81].mxu0 }
 0x580   :  { %v4618_v44 = vpop.f32.mrb[82].mxu0 }
 0x581   :  { %v3008_v45 = vpack.c.bf16 %v4618_v44, %v4617_v38  ;;  %4582 = vmatpush3.bf16.msra.mxu1 %v2537_v4  ;;  %v2947_v42 = vpop.f32.mrb[83].mxu0  ;;  %v3419_v4 = vld [vmem:[#allocation16 + $0x70] sm:$0xff] }
 0x582   :  { %v3007_v50 = vpack.c.bf16 %v2947_v42, %v2944_v39  ;;  %4695 = vmatprep.subr.bf16.mxu1 %v5427_v5  ;;  %v4865_v42 = vpack.c.bf16 %v3420_v33, %v3419_v4 }
 0x584   :  { %4584 = vmatmul.mubr.bf16.vlgmr.msra.gmra.mrb[64].mxu1 %v5119_v51  ;;  %4663 = vmatprep.subr.bf16.mxu0 %v3007_v50 }
 0x585   :  { %4664 = vmatpush3.bf16.msra.mxu0 %v3007_v50  ;;  %4587 = vmatprep.mubr.bf16.mxu1 %v5120_v43 }
 0x586   :  { %v4621_v54 = vpop.f32.mrb[84].mxu0  ;;  %4665 = vmatprep.subr.bf16.mxu0 %v3008_v45 }
 0x587   :  { %v2960_v56 = vpop.f32.mrb[85].mxu0 }
 0x588   :  { %v4622_v46 = vpop.f32.mrb[86].mxu0 }
 0x589   :  { %v3010_v25 = vpack.c.bf16 %v4622_v46, %v4621_v54  ;;  %v2963_v57 = vpop.f32.mrb[87].mxu0  ;;  %4666 = vmatpush3.bf16.msra.mxu0 %v3008_v45 }
 0x58a   :  { %v3009_v58 = vpack.c.bf16 %v2963_v57, %v2960_v56 }
 0x58c   :  { %4588 = vmatmul.mubr.bf16.gmra.mrb[68].mxu1 %v5121_v47  ;;  %4667 = vmatprep.subr.bf16.mxu0 %v3009_v58 }
 0x58d   :  { %4668 = vmatpush3.bf16.msra.mxu0 %v3009_v58  ;;  %4591 = vmatprep.mubr.bf16.mxu1 %v5122_v52 }
 0x58e   :  { %v4625_v53 = vpop.f32.mrb[88].mxu0  ;;  %4669 = vmatprep.subr.bf16.mxu0 %v3010_v25 }
 0x58f   :  { %v2976_v61 = vpop.f32.mrb[89].mxu0 }
 0x590   :  { %v4626_v55 = vpop.f32.mrb[90].mxu0 }
 0x591   :  { %v3012_v62 = vpack.c.bf16 %v4626_v55, %v4625_v53  ;;  %v2979_v13 = vpop.f32.mrb[91].mxu0  ;;  %4670 = vmatpush3.bf16.msra.mxu0 %v3010_v25 }
 0x592   :  { %v3011_v16 = vpack.c.bf16 %v2979_v13, %v2976_v61 }
 0x594   :  { %4592 = vmatmul.mubr.bf16.gmra.mrb[72].mxu1 %v5123_v21  ;;  %4671 = vmatprep.subr.bf16.mxu0 %v3011_v16 }
 0x595   :  { %4672 = vmatpush3.bf16.msra.mxu0 %v3011_v16  ;;  %4595 = vmatprep.mubr.bf16.mxu1 %v5124_v24 }
 0x596   :  { %v4629_v63 = vpop.f32.mrb[92].mxu0  ;;  %4673 = vmatprep.subr.bf16.mxu0 %v3012_v62 }
 0x597   :  { %v2992_v29 = vpop.f32.mrb[93].mxu0 }
 0x598   :  { %v4630_v32 = vpop.f32.mrb[94].mxu0 }
 0x599   :  { %v3014_v37 = vpack.c.bf16 %v4630_v32, %v4629_v63  ;;  %v2995_v0 = vpop.f32.mrb[95].mxu0  ;;  %4674 = vmatpush3.bf16.msra.mxu0 %v3012_v62 }
 0x59a   :  { %v3013_v7 = vpack.c.bf16 %v2995_v0, %v2992_v29 }
 0x59c   :  { %4596 = vmatmul.mubr.bf16.gmra.mrb[76].mxu1 %v5125_v49  ;;  %4675 = vmatprep.subr.bf16.mxu0 %v3013_v7 }
 0x59d   :  { %4676 = vmatpush3.bf16.msra.mxu0 %v3013_v7  ;;  %4711 = vmatprep.mubr.msk.bf16.mxu1 %vm5428_vm0, %v5427_v5 }
 0x59e   :  { %4677 = vmatprep.subr.bf16.mxu0 %v3014_v37 }
 0x5a1   :  { %4678 = vmatpush3.bf16.msra.mxu0 %v3014_v37 }
 0x5a2   :  { %4838 = vmatprep.subr.bf16.mxu0 %v4837_v9 }
 0x5a4   :  { %4680 = vmatmul.mubr.bf16.vlgmr.msra.gmra.mrb[96].mxu0 %v5126_v19 }
 0x5a5   :  { %4683 = vmatprep.mubr.bf16.mxu0 %v5127_v41  ;;  %4840 = vmatpush3.bf16.msra.mxu0 %v4837_v9 }
 0x5a6   :  { %4842 = vmatprep.subr.bf16.mxu0 %v4841_v14 }
 0x5a9   :  { %4844 = vmatpush3.bf16.msra.mxu0 %v4841_v14 }
 0x5aa   :  { %4846 = vmatprep.subr.bf16.mxu0 %v4845_v35 }
 0x5ac   :  { %4684 = vmatmul.mubr.bf16.gmra.mrb[100].mxu0 %v5128_v40 }
 0x5ad   :  { %4687 = vmatprep.mubr.bf16.mxu0 %v5129_v2  ;;  %4848 = vmatpush3.bf16.msra.mxu0 %v4845_v35 }
 0x5ae   :  { %4850 = vmatprep.subr.bf16.mxu0 %v4849_v59 }
 0x5b1   :  { %4852 = vmatpush3.bf16.msra.mxu0 %v4849_v59 }
 0x5b2   :  { %4854 = vmatprep.subr.bf16.mxu0 %v4853_v17 }
 0x5b4   :  { %4688 = vmatmul.mubr.bf16.gmra.mrb[104].mxu0 %v5130_v8 }
 0x5b5   :  { %4691 = vmatprep.mubr.bf16.mxu0 %v5131_v1  ;;  %4856 = vmatpush3.bf16.msra.mxu0 %v4853_v17 }
 0x5b6   :  { %4858 = vmatprep.subr.bf16.mxu0 %v4857_v3 }
 0x5b9   :  { %4860 = vmatpush3.bf16.msra.mxu0 %v4857_v3 }
 0x5ba   :  { %4862 = vmatprep.subr.bf16.mxu0 %v4861_v31 }
 0x5bc   :  { %4692 = vmatmul.mubr.bf16.gmra.mrb[108].mxu0 %v5132_v27 }
 0x5bd   :  { %4864 = vmatpush3.bf16.msra.mxu0 %v4861_v31 }
 0x5be   :  { %4866 = vmatprep.subr.bf16.mxu0 %v4865_v42 }
 0x5c1   :  { %4868 = vmatpush3.bf16.msra.mxu0 %v4865_v42 }
 0x657   :  { %v4585_v34 = vpop.f32.mrb[64].mxu1 }
 0x658   :  { %v2788_v38 = vadd.f32 %v4585_v34, %v3755_v30  ;;  %v2717_v39 = vpop.f32.mrb[65].mxu1 }
 0x659   :  { %v2786_v44 = vadd.f32 %v3755_v30, %v2717_v39  ;;  %v4586_v45 = vpop.f32.mrb[66].mxu1 }
 0x65a   :  { %v2789_v50 = vadd.f32 %v4586_v45, %v3755_v30  ;;  %v2720_v51 = vpop.f32.mrb[67].mxu1  ;;  %v2804_v54 = vmax.f32 %v2788_v38, 0.0 }
 0x65b   :  { %v2787_v43 = vadd.f32 %v3755_v30, %v2720_v51  ;;  %v2802_v46 = vmax.f32 %v2786_v44, 0.0 }
 0x65c   :  { %v2805_v56 = vmax.f32 %v2789_v50, 0.0 }
 0x65d   :  { %v2803_v25 = vmax.f32 %v2787_v43, 0.0 }
 0x65e   :  { %v5954_v57 = vpack.c.bf16 %v2805_v56, %v2804_v54 }
 0x65f   :  { %v5956_v58 = vpack.c.bf16 %v2803_v25, %v2802_v46  ;;  %v4589_v47 = vpop.f32.mrb[68].mxu1 }
 0x660   :  { %v2792_v52 = vadd.f32 %v4589_v47, %v3755_v30  ;;  %v2733_v53 = vpop.f32.mrb[69].mxu1 }
 0x661   :  { %v2790_v61 = vadd.f32 %v3755_v30, %v2733_v53  ;;  %v4590_v55 = vpop.f32.mrb[70].mxu1 }
 0x662   :  { %v2793_v62 = vadd.f32 %v4590_v55, %v3755_v30  ;;  %v2736_v13 = vpop.f32.mrb[71].mxu1  ;;  %v2808_v21 = vmax.f32 %v2792_v52, 0.0 }
 0x663   :  { %v2791_v16 = vadd.f32 %v3755_v30, %v2736_v13  ;;  %v2806_v63 = vmax.f32 %v2790_v61, 0.0 }
 0x664   :  { %v2809_v24 = vmax.f32 %v2793_v62, 0.0 }
 0x665   :  { %v2807_v29 = vmax.f32 %v2791_v16, 0.0 }
 0x666   :  { %v5958_v32 = vpack.c.bf16 %v2809_v24, %v2808_v21 }
 0x667   :  { %v5960_v37 = vpack.c.bf16 %v2807_v29, %v2806_v63  ;;  %v4593_v0 = vpop.f32.mrb[72].mxu1 }
 0x668   :  { %v2796_v7 = vadd.f32 %v4593_v0, %v3755_v30  ;;  %v2749_v49 = vpop.f32.mrb[73].mxu1 }
 0x669   :  { %v2794_v19 = vadd.f32 %v3755_v30, %v2749_v49  ;;  %v4594_v41 = vpop.f32.mrb[74].mxu1 }
 0x66a   :  { %v2797_v40 = vadd.f32 %v4594_v41, %v3755_v30  ;;  %v2752_v2 = vpop.f32.mrb[75].mxu1  ;;  %v2812_v1 = vmax.f32 %v2796_v7, 0.0 }
 0x66b   :  { %v2795_v8 = vadd.f32 %v3755_v30, %v2752_v2  ;;  %v2810_v26 = vmax.f32 %v2794_v19, 0.0 }
 0x66c   :  { %v2813_v27 = vmax.f32 %v2797_v40, 0.0 }
 0x66d   :  { %v2811_v11 = vmax.f32 %v2795_v8, 0.0 }
 0x66e   :  { %v5962_v48 = vpack.c.bf16 %v2813_v27, %v2812_v1 }
 0x66f   :  { %v5964_v9 = vpack.c.bf16 %v2811_v11, %v2810_v26  ;;  %v4597_v12 = vpop.f32.mrb[76].mxu1 }
 0x670   :  { %v2800_v14 = vadd.f32 %v4597_v12, %v3755_v30  ;;  %v2765_v10 = vpop.f32.mrb[77].mxu1 }
 0x671   :  { %v2798_v36 = vadd.f32 %v3755_v30, %v2765_v10  ;;  %v4598_v35 = vpop.f32.mrb[78].mxu1 }
 0x672   :  { %v2801_v60 = vadd.f32 %v4598_v35, %v3755_v30  ;;  %v2768_v15 = vpop.f32.mrb[79].mxu1  ;;  %v2816_v6 = vmax.f32 %v2800_v14, 0.0 }
 0x673   :  { %v2799_v59 = vadd.f32 %v3755_v30, %v2768_v15  ;;  %v2814_v17 = vmax.f32 %v2798_v36, 0.0 }
 0x674   :  { %v2817_v20 = vmax.f32 %v2801_v60, 0.0 }
 0x675   :  { %v2815_v18 = vmax.f32 %v2799_v59, 0.0 }
 0x676   :  { %v5969_v3 = vpack.c.bf16 %v2817_v20, %v2816_v6 }
 0x677   :  { %v5971_v23 = vpack.c.bf16 %v2815_v18, %v2814_v17  ;;  %v4681_v28 = vpop.f32.mrb[96].mxu0 }
 0x678   :  { %v3265_v31 = vadd.f32 %v4681_v28, %v3773_v22  ;;  %v3194_v4 = vpop.f32.mrb[97].mxu0 }
 0x679   :  { %v3263_v33 = vadd.f32 %v3773_v22, %v3194_v4  ;;  %v4682_v34 = vpop.f32.mrb[98].mxu0  ;;  %v5115_v4 = vld [vmem:[%s6044_s10] sm:$0xff]  }
 0x67a   :  { %v3266_v38 = vadd.f32 %v4682_v34, %v3773_v22  ;;  %v3197_v39 = vpop.f32.mrb[99].mxu0  ;;  %v3281_v44 = vmax.f32 %v3265_v31, 0.0  ;;  %v3426_v34 = vld [vmem:[#allocation17 + $0x28] sm:$0xff] }
 0x67b   :  { %v3264_v30 = vadd.f32 %v3773_v22, %v3197_v39  ;;  %v3279_v42 = vmax.f32 %v3263_v33, 0.0 }
 0x67c   :  { %v3282_v45 = vmax.f32 %v3266_v38, 0.0  ;;  %v3428_v38 = vld [vmem:[#allocation17 + $0x38] sm:$0xff] }
 0x67d   :  { %v3280_v50 = vmax.f32 %v3264_v30, 0.0  ;;  %v3429_v30 = vld [vmem:[#allocation17 + $0x40] sm:$0xff] }
 0x67e   :  { %v3296_v51 = vpack.c.bf16 %v3282_v45, %v3281_v44  ;;  %v3431_v45 = vld [vmem:[#allocation17 + $0x50] sm:$0xff] }
 0x67f   :  { %v3295_v43 = vpack.c.bf16 %v3280_v50, %v3279_v42  ;;  %v4685_v54 = vpop.f32.mrb[100].mxu0  ;;  %v3432_v42 = vld [vmem:[#allocation17 + $0x58] sm:$0xff] }
 0x680   :  { %v3269_v56 = vadd.f32 %v4685_v54, %v3773_v22  ;;  %v3210_v46 = vpop.f32.mrb[101].mxu0  ;;  %v4825_v50 = vpack.c.bf16 %v3432_v42, %v3431_v45 }
 0x681   :  { %v3267_v25 = vadd.f32 %v3773_v22, %v3210_v46  ;;  %v4686_v47 = vpop.f32.mrb[102].mxu0  ;;  %4696 = vmatpush3.bf16.msra.mxu1 %v3295_v43  ;;  %v3434_v43 = vld [vmem:[#allocation17 + $0x68] sm:$0xff]  ;;  %v3436_v46 = vld [vmem:[#allocation17 + $0x78] sm:$0xff] }
 0x682   :  { %v3270_v52 = vadd.f32 %v4686_v47, %v3773_v22  ;;  %v3213_v53 = vpop.f32.mrb[103].mxu0  ;;  %4697 = vmatprep.subr.bf16.mxu1 %v5427_v5  ;;  %v3285_v55 = vmax.f32 %v3269_v56, 0.0  ;;  %v3435_v56 = vld [vmem:[#allocation17 + $0x70] sm:$0xff] }
 0x683   :  { %v3268_v61 = vadd.f32 %v3773_v22, %v3213_v53  ;;  %v3283_v13 = vmax.f32 %v3267_v25, 0.0  ;;  %v4833_v25 = vpack.c.bf16 %v3436_v46, %v3435_v56 }
 0x684   :  { %v3286_v62 = vmax.f32 %v3270_v52, 0.0 }
 0x685   :  { %v3284_v16 = vmax.f32 %v3268_v61, 0.0  ;;  %4698 = vmatpush3.bf16.msra.mxu1 %v3296_v51  ;;  %v3433_v51 = vld [vmem:[#allocation17 + $0x60] sm:$0xff] }
 0x686   :  { %v3298_v21 = vpack.c.bf16 %v3286_v62, %v3285_v55  ;;  %4699 = vmatprep.subr.bf16.mxu1 %v5427_v5  ;;  %v4829_v54 = vpack.c.bf16 %v3434_v43, %v3433_v51 }
 0x687   :  { %v3297_v24 = vpack.c.bf16 %v3284_v16, %v3283_v13  ;;  %v4689_v63 = vpop.f32.mrb[104].mxu0 }
 0x688   :  { %v3273_v29 = vadd.f32 %v4689_v63, %v3773_v22  ;;  %v3226_v0 = vpop.f32.mrb[105].mxu0 }
 0x689   :  { %v3271_v7 = vadd.f32 %v3773_v22, %v3226_v0  ;;  %v4690_v49 = vpop.f32.mrb[106].mxu0  ;;  %4700 = vmatpush3.bf16.msra.mxu1 %v3297_v24 }
 0x68a   :  { %v3274_v19 = vadd.f32 %v4690_v49, %v3773_v22  ;;  %v3229_v41 = vpop.f32.mrb[107].mxu0  ;;  %4701 = vmatprep.subr.bf16.mxu1 %v5427_v5  ;;  %v3289_v2 = vmax.f32 %v3273_v29, 0.0 }
 0x68b   :  { %v3272_v40 = vadd.f32 %v3773_v22, %v3229_v41  ;;  %v3287_v1 = vmax.f32 %v3271_v7, 0.0 }
 0x68c   :  { %v3290_v8 = vmax.f32 %v3274_v19, 0.0 }
 0x68d   :  { %v3288_v27 = vmax.f32 %v3272_v40, 0.0  ;;  %4702 = vmatpush3.bf16.msra.mxu1 %v3298_v21 }
 0x68e   :  { %v3300_v26 = vpack.c.bf16 %v3290_v8, %v3289_v2  ;;  %4703 = vmatprep.subr.bf16.mxu1 %v5427_v5 }
 0x68f   :  { %v3299_v11 = vpack.c.bf16 %v3288_v27, %v3287_v1  ;;  %v4693_v12 = vpop.f32.mrb[108].mxu0 }
 0x690   :  { %v3277_v14 = vadd.f32 %v4693_v12, %v3773_v22  ;;  %v3242_v10 = vpop.f32.mrb[109].mxu0 }
 0x691   :  { %v3275_v36 = vadd.f32 %v3773_v22, %v3242_v10  ;;  %v4694_v35 = vpop.f32.mrb[110].mxu0  ;;  %4704 = vmatpush3.bf16.msra.mxu1 %v3299_v11 }
 0x692   :  { %v3278_v60 = vadd.f32 %v4694_v35, %v3773_v22  ;;  %v3245_v15 = vpop.f32.mrb[111].mxu0  ;;  %4705 = vmatprep.subr.bf16.mxu1 %v5427_v5  ;;  %v3293_v6 = vmax.f32 %v3277_v14, 0.0 }
 0x693   :  { %v3276_v59 = vadd.f32 %v3773_v22, %v3245_v15  ;;  %v3291_v17 = vmax.f32 %v3275_v36, 0.0  ;;  %v3424_v22 = vld [vmem:[#allocation17 + $0x18] sm:$0xff] }
 0x694   :  { %v3294_v20 = vmax.f32 %v3278_v60, 0.0 }
 0x695   :  { %v3292_v18 = vmax.f32 %v3276_v59, 0.0  ;;  %4706 = vmatpush3.bf16.msra.mxu1 %v3300_v26 }
 0x696   :  { %v3302_v28 = vpack.c.bf16 %v3294_v20, %v3293_v6  ;;  %4707 = vmatprep.subr.bf16.mxu1 %v5427_v5 }
 0x697   :  { %v3301_v31 = vpack.c.bf16 %v3292_v18, %v3291_v17 }
 0x699   :  { %4708 = vmatpush3.bf16.msra.mxu1 %v3301_v31 }
 0x69a   :  { %4709 = vmatprep.subr.bf16.mxu1 %v5427_v5 }
 0x69d   :  { %4710 = vmatpush3.bf16.msra.mxu1 %v3302_v28 }
 0x69e   :  { %4715 = vmatprep.subr.bf16.mxu1 %v5427_v5 }
 0x6a0   :  { %4712 = vmatmul.mubr.bf16.vlgmr.msra.gmra.mrb[80].mxu1 %v5115_v4 }
 0x6a1   :  { %4716 = vmatpush3.bf16.msra.mxu1 %v5956_v58  ;;  %4731 = vmatprep.mubr.msk.bf16.mxu1 %vm5428_vm0, %v5427_v5  ;;  %v3421_v58 = vld [vmem:[#allocation17] sm:$0xff] }
 0x6a2   :  { %4717 = vmatprep.subr.bf16.mxu1 %v5427_v5 }
 0x6a5   :  { %4718 = vmatpush3.bf16.msra.mxu1 %v5954_v57  ;;  %v5116_v57 = vld [vmem:[%s6045_s11] sm:$0xff]   ;;  %s5429_s11 = smov [#allocation20]  }
 0x6a6   :  { %4719 = vmatprep.subr.bf16.mxu1 %v5427_v5  ;;  %s3615_s28 = sshll.u32 %s5429_s11, 4  ;;  %s3616_s28 = int_to_ptr.vmem [resolvable:$true] %s3615_s28 }
 0x6a7   :  { %s5353_s23 = scalar_lea.vmem %s3616_s28, 512  ;;  %p5358_p11 = scmp.lt.s32.totalorder %s3616_s28, %s3616_s28 }
 0x6a8   :  { %p5354_p10 = scmp.ne.s32.totalorder %s3616_s28, %s5353_s23  ;;  %p5359_p12 = scmp.lt.s32.totalorder %s5353_s23, %s5353_s23 }
 0x6a9   :  { %4720 = vmatpush3.bf16.msra.mxu1 %v5960_v37 }
 0x6aa   :  { %4721 = vmatprep.subr.bf16.mxu1 %v5427_v5  ;;  %p5360_p13 = por %p5359_p12, %p5358_p11 }
 0x6ac   :  { %p5361_p0 = pnand %p5360_p13, %p5354_p10 }
 0x6ad   :  { %4722 = vmatpush3.bf16.msra.mxu1 %v5958_v32  ;;  %v3422_v32 = vld [vmem:[#allocation17 + $0x8] sm:$0xff] }
 0x6ae   :  { %4723 = vmatprep.subr.bf16.mxu1 %v5427_v5  ;;  %v4805_v37 = vpack.c.bf16 %v3422_v32, %v3421_v58 }
 0x6b1   :  { %4724 = vmatpush3.bf16.msra.mxu1 %v5964_v9  ;;  %v3423_v9 = vld [vmem:[#allocation17 + $0x10] sm:$0xff] }
 0x6b2   :  { %4725 = vmatprep.subr.bf16.mxu1 %v5427_v5  ;;  %v4809_v33 = vpack.c.bf16 %v3424_v22, %v3423_v9 }
 0x6b5   :  { %4726 = vmatpush3.bf16.msra.mxu1 %v5962_v48  ;;  %v3425_v48 = vld [vmem:[#allocation17 + $0x20] sm:$0xff] }
 0x6b6   :  { %4727 = vmatprep.subr.bf16.mxu1 %v5427_v5 }
 0x6b9   :  { %4728 = vmatpush3.bf16.msra.mxu1 %v5971_v23  ;;  %v4813_v23 = vpack.c.bf16 %v3426_v34, %v3425_v48 }
 0x6ba   :  { %4729 = vmatprep.subr.bf16.mxu1 %v5427_v5  ;;  %v3427_v5 = vld [vmem:[#allocation17 + $0x30] sm:$0xff] }
 0x6bb   :  { %v4817_v39 = vpack.c.bf16 %v3428_v38, %v3427_v5 }
 0x6bd   :  { %4730 = vmatpush3.bf16.msra.mxu1 %v5969_v3  ;;  %v3430_v3 = vld [vmem:[#allocation17 + $0x48] sm:$0xff] }
 0x6be   :  { %4806 = vmatprep.subr.bf16.mxu1 %v4805_v37  ;;  %v4821_v44 = vpack.c.bf16 %v3430_v3, %v3429_v30 }
 0x6c0   :  { %4732 = vmatmul.mubr.bf16.vlgmr.msra.gmra.mrb[84].mxu1 %v5116_v57 }
 0x6c1   :  { %4808 = vmatpush3.bf16.msra.mxu1 %v4805_v37 }
 0x6c2   :  { %4810 = vmatprep.subr.bf16.mxu1 %v4809_v33 }
 0x6c5   :  { %4812 = vmatpush3.bf16.msra.mxu1 %v4809_v33 }
 0x6c6   :  { %4814 = vmatprep.subr.bf16.mxu1 %v4813_v23 }
 0x6c9   :  { %4816 = vmatpush3.bf16.msra.mxu1 %v4813_v23 }
 0x6ca   :  { %4818 = vmatprep.subr.bf16.mxu1 %v4817_v39 }
 0x6cd   :  { %4820 = vmatpush3.bf16.msra.mxu1 %v4817_v39 }
 0x6ce   :  { %4822 = vmatprep.subr.bf16.mxu1 %v4821_v44 }
 0x6d1   :  { %4824 = vmatpush3.bf16.msra.mxu1 %v4821_v44 }
 0x6d2   :  { %4826 = vmatprep.subr.bf16.mxu1 %v4825_v50 }
 0x6d5   :  { %4828 = vmatpush3.bf16.msra.mxu1 %v4825_v50 }
 0x6d6   :  { %4830 = vmatprep.subr.bf16.mxu1 %v4829_v54 }
 0x6d9   :  { %4832 = vmatpush3.bf16.msra.mxu1 %v4829_v54 }
 0x6da   :  { %4834 = vmatprep.subr.bf16.mxu1 %v4833_v25 }
 0x6dd   :  { %4836 = vmatpush3.bf16.msra.mxu1 %v4833_v25 }
 0x773   :  { %v3345_v47 = vpop.f32.mrb[80].mxu1 }
 0x774   :  { %3401 = vst [vmem:[#allocation20] sm:$0xff] %v3345_v47  ;;  %v4713_v52 = vpop.f32.mrb[81].mxu1  ;;  %4802 = vmatprep.mubr.f32.mxu0 %v3345_v47 }
 0x775   :  { %v3348_v53 = vpop.f32.mrb[82].mxu1 }
 0x776   :  { %3402 = vst [vmem:[#allocation20 + $0x10] sm:$0xff] %v3348_v53  ;;  %v4714_v61 = vpop.f32.mrb[83].mxu1  ;;  %4803 = vmatmul.mubr.f32.vlgmr.msra.gmra.mrb[112].mxu0 %v3348_v53 }
 0x793   :  { %v3394_v55 = vpop.f32.mrb[84].mxu1 }
 0x794   :  { %3403 = vst [vmem:[#allocation20 + $0x8] sm:$0xff] %v3394_v55  ;;  %v4733_v62 = vpop.f32.mrb[85].mxu1  ;;  %4767 = vmatprep.mubr.f32.mxu1 %v3394_v55 }
 0x795   :  { %v3397_v13 = vpop.f32.mrb[86].mxu1 }
 0x796   :  { %3404 = vst [vmem:[#allocation20 + $0x18] sm:$0xff] %v3397_v13  ;;  %v4734_v16 = vpop.f32.mrb[87].mxu1  ;;  %4768 = vmatmul.mubr.f32.vlgmr.msra.gmra.mrb[88].mxu1 %v3397_v13 }
 0x797   :  { %5364 = shalt.err (!%p5361_p0)
}
 0x798   :  { %s5365_s27 = scalar_lea.hbm %s6050_s16, 512 }
 0x799   :  { %p5366_p1 = scmp.ne.s32.totalorder %s6050_s16, %s5365_s27  ;;  %p5369_p2 = scmp.lt.u32.totalorder %s5365_s27, %s6050_s16 }
 0x79b   :  { %p5371_p3 = pnand %p5369_p2, %p5366_p1 }
 0x79d   :  { %5374 = shalt.err (!%p5371_p3)
}
 0x79e   :  { %s5430_s13 = smov 256   ;;  %s5431_s3 = smov 16   ;;  %v3776_v29 = vld [vmem:[%s6048_s14] ss:$0 sm:$0xff] }
 0x79f   :  { %3621 = dma.vmem_to_hbm [thread:$0]  %s3616_s28, 512, %s6050_s16, [#allocation21], %s5430_s13, %s5430_s13, %s5431_s3  }
 0x7a0   :  { %s5432_s21 = smov [#allocation19]  }
 0x7a1   :  { %s3603_s25 = sshll.u32 %s5432_s21, 4  ;;  %s3604_s25 = int_to_ptr.vmem [resolvable:$true] %s3603_s25 }
 0x7a2   :  { %s5375_s19 = scalar_lea.vmem %s3604_s25, 256  ;;  %p5380_p5 = scmp.lt.s32.totalorder %s3604_s25, %s3604_s25 }
 0x7a3   :  { %p5376_p4 = scmp.ne.s32.totalorder %s3604_s25, %s5375_s19  ;;  %p5381_p6 = scmp.lt.s32.totalorder %s5375_s19, %s5375_s19 }
 0x7a5   :  { %p5382_p7 = por %p5381_p6, %p5380_p5 }
 0x7a7   :  { %p5383_p8 = pnand %p5382_p7, %p5376_p4 }
 0x849   :  { %v4804_v21 = vpop.f32.mrb[112].mxu0 }
 0x84a   :  { %v3578_v24 = vpop.f32.mrb[113].mxu0 }
 0x869   :  { %v4769_v63 = vpop.f32.mrb[88].mxu1 }
 0x86a   :  { %v3584_v0 = vadd.f32 %v4804_v21, %v4769_v63  ;;  %v3503_v7 = vpop.f32.mrb[89].mxu1 }
 0x86b   :  { %v3579_v49 = vadd.f32 %v3578_v24, %v3503_v7 }
 0x86c   :  { %v3595_v19 = vadd.f32 %v3776_v29, %v3584_v0 }
 0x86d   :  { %v3594_v41 = vadd.f32 %v3776_v29, %v3579_v49 }
 0x86e   :  { %3597 = vst [vmem:[#allocation19 + $0x8] sm:$0xff] %v3595_v19 }
 0x86f   :  { %3596 = vst [vmem:[#allocation19] sm:$0xff] %v3594_v41 }
 0x870   :  { %5386 = shalt.err (!%p5383_p8)
}
 0x871   :  { %s5387_s14 = scalar_lea.hbm %s6049_s15, 256 }
 0x872   :  { %p5388_p9 = scmp.ne.s32.totalorder %s6049_s15, %s5387_s14  ;;  %p5391_p10 = scmp.lt.u32.totalorder %s5387_s14, %s6049_s15 }
 0x874   :  { %p5393_p11 = pnand %p5391_p10, %p5388_p9 }
 0x876   :  { %5396 = shalt.err (!%p5393_p11)
}
 0x877   :  { %3609 = dma.vmem_to_hbm [thread:$0]  %s3604_s25, 256, %s6049_s15, [#allocation4], %s5424_s7, %s5424_s7, %s5425_s18  }
 0x878   :  { %5409 = dma.done.wait [#allocation4], 256  }
 0x879   :  { %5410 = vsyncadd [#allocation4], 4294967040 }
 0x87a   :  { %5411 = dma.done.wait [#allocation21], 512  }
 0x87b   :  { %5412 = vsyncadd [#allocation21], 4294966784 }
 0x87c   :  { %3628 = vsyncpa [#allocation3], 1 }
 0x87d   :  { %3629 = vsyncpa [#allocation6], 1 }
 0x87e   :  { %3630 = vsyncpa [#allocation9], 1 }
 0x87f   :  { %3631 = vsyncpa [#allocation12], 1 }
 0x880   :  { %3632 = vsyncpa [#allocation15], 1 }
 0x881   :  { %3633 = vsyncpa [#allocation18], 1 }
 0x882   :  { %3634 = vsyncpa [#allocation4], 1 }
 0x883   :  { %3635 = vsyncpa [#allocation21], 1 }

</bundles_post_ra>
